<compile_context>
chip_gen: v5e
topology: v5e:2x2
jax: 0.10.0
libtpu: 0.0.40
codegen_flags: <defaults>
</compile_context>

<pallas_src>
import functools

import jax
import jax.numpy as jnp
from jax.experimental import pallas as pl
from jax.experimental.pallas import tpu as pltpu


# -----------------------------------------------------------------------------
# Fused Pallas kernel: all GAAT layers + decoder MLP for one batch block.
# Grid = (batch_blocks, num_layers); layer axis last ("arbitrary"); the running
# activation is carried across layers in the VMEM scratch xs_ref.
# -----------------------------------------------------------------------------
def gaat_fused_kernel(x_ref, mask_ref,
                      wqkv_ref, bqkv_ref, wo_ref, bo_ref,
                      wg_ref, bgc_ref, w1_ref, b1_ref, gamma_ref, beta_ref,
                      dw1_ref, db1_ref, dw2_ref, db2_ref,
                      out_ref, xs_ref,
                      *, heads, bt, n_pad, dh_real, d_real):
    layer = pl.program_id(1)
    n_layers = pl.num_programs(1)

    # Load the lane-padded activation block into the resident scratch once per
    # batch block; it stays in VMEM for the whole layer stack.
    @pl.when(layer == 0)
    def _():
        xs_ref[...] = x_ref[...].astype(jnp.float32)

    x = xs_ref[...]                                   # (Mb, Dp) f32, Mb = bt*n_pad
    mb, dp = x.shape
    dh_pad = dp // heads
    xb = x.astype(jnp.bfloat16)

    # --- fused Q/K/V projection: ONE fat (Mb, Dp) @ (Dp, 3*Dp) matmul ---------
    qkv = jnp.dot(xb, wqkv_ref[...],
                  preferred_element_type=jnp.float32) + bqkv_ref[...]   # (Mb, 3*Dp)

    addmask = mask_ref[...].astype(jnp.float32)        # (Np, Np) additive mask
    scale = 1.0 / (dh_real ** 0.5)

    # --- attention: per-head, batched over the Bt batch elements --------------
    # NT-layout score einsum (contract last dims) is the standard Mosaic
    # pattern; K is not pre-transposed.
    ctx_heads = []
    for h in range(heads):
        q_h = qkv[:, h * dh_pad:(h + 1) * dh_pad]
        k_h = qkv[:, dp + h * dh_pad: dp + (h + 1) * dh_pad]
        v_h = qkv[:, 2 * dp + h * dh_pad: 2 * dp + (h + 1) * dh_pad]
        q3 = q_h.astype(jnp.bfloat16).reshape(bt, n_pad, dh_pad)
        k3 = k_h.astype(jnp.bfloat16).reshape(bt, n_pad, dh_pad)
        v3 = v_h.astype(jnp.bfloat16).reshape(bt, n_pad, dh_pad)

        s = jnp.einsum("bnk,bmk->bnm", q3, k3,
                       preferred_element_type=jnp.float32)              # (Bt,Np,Np)
        s = s * scale + addmask[None]
        s = s - jnp.max(s, axis=-1, keepdims=True)
        p = jnp.exp(s)
        p = p * pl.reciprocal(jnp.sum(p, axis=-1, keepdims=True), approx=True)

        c = jnp.einsum("bnm,bmk->bnk", p.astype(jnp.bfloat16), v3,
                       preferred_element_type=jnp.float32)              # (Bt,Np,dh)
        ctx_heads.append(c.reshape(bt * n_pad, dh_pad))

    ctx = jnp.concatenate(ctx_heads, axis=-1)          # (Mb, Dp) lane-concat heads

    # --- fused output projection: ONE (Mb, Dp) @ (Dp, Dp) matmul --------------
    context = jnp.dot(ctx.astype(jnp.bfloat16), wo_ref[...],
                      preferred_element_type=jnp.float32) + bo_ref[...]

    # --- gated fusion: single fused lane reduction for both gate dot-products -
    wg = wg_ref[...]                                   # (2, Dp) f32
    glog = jnp.sum(x * wg[0:1, :] + context * wg[1:2, :],
                   axis=-1, keepdims=True) + bgc_ref[...]
    gate = jax.nn.sigmoid(glog)
    fusion = x * gate + context * (1.0 - gate)         # dropout = identity (eval)

    # --- ResMLP: y = f + relu(f W1 + b1) --------------------------------------
    hid = fusion + jax.nn.relu(
        jnp.dot(fusion.astype(jnp.bfloat16), w1_ref[...],
                preferred_element_type=jnp.float32) + b1_ref[...])

    # --- LayerNorm over the REAL model dim (pad lanes masked out) -------------
    lane = jax.lax.broadcasted_iota(jnp.int32, (1, dp), 1)
    valid = (lane < d_real).astype(jnp.float32)        # (1, Dp)
    inv_d = 1.0 / d_real
    mean = jnp.sum(hid * valid, axis=-1, keepdims=True) * inv_d
    cent = (hid - mean) * valid
    var = jnp.sum(cent * cent, axis=-1, keepdims=True) * inv_d
    y = cent * jax.lax.rsqrt(var + 1e-5) * gamma_ref[...] + beta_ref[...]

    xs_ref[...] = y

    # --- decoder MLP, fused into the last layer iteration ---------------------
    @pl.when(layer == n_layers - 1)
    def _():
        z = jax.nn.relu(
            jnp.dot(y.astype(jnp.bfloat16), dw1_ref[...],
                    preferred_element_type=jnp.float32) + db1_ref[...])
        o = jnp.dot(z.astype(jnp.bfloat16), dw2_ref[...],
                    preferred_element_type=jnp.float32) + db2_ref[...]
        out_ref[...] = o.astype(out_ref.dtype)


# -----------------------------------------------------------------------------
# Host-side helpers: padding, packing, per-generation sizing
# -----------------------------------------------------------------------------
def _round_up(v, m):
    return (v + m - 1) // m * m


def _pad2(w, rows, cols):
    out = jnp.zeros((rows, cols), w.dtype)
    return out.at[: w.shape[0], : w.shape[1]].set(w)


def _pad1(v, n):
    out = jnp.zeros((n,), v.dtype)
    return out.at[: v.shape[0]].set(v)


def _vmem_capacity_bytes():
    try:
        info = pltpu.get_tpu_info()
        cap = getattr(info, "vmem_capacity_bytes", None)
        if cap:
            return int(cap)
    except Exception:
        pass
    return 64 * 1024 * 1024          # conservative default (v7x per-TC)


def _pick_vmem_limit(cap):
    # ~75% of physical: 48 MiB on v7x (64 MiB), 96 MiB on v5e/v6e (128 MiB).
    return min(3 * cap // 4, 112 * 1024 * 1024)


def _pick_batch_block(B, n_pad, cap):
    """Fat M (= Bt*Np rows) for the projection matmuls, but keep >= 2 (even)
    batch blocks when possible so v7x's two TensorCores stay balanced on the
    'parallel' grid axis. Row target shrinks on 64 MiB-VMEM parts."""
    target_rows = 512 if cap >= 96 * 1024 * 1024 else 256
    bt = max(1, min(B, target_rows // max(n_pad, 1)))
    while bt > 1 and (B % bt != 0 or (B // bt) < 2 or (B // bt) % 2 != 0):
        bt -= 1
    if B % bt != 0:
        bt = 1
    return bt


def prepare_fused_inputs(params, heads):
    layers = params["layers"]
    L = len(layers)
    D = layers[0]["wq"].shape[0]
    assert D % heads == 0
    dh = D // heads
    D_pad = _round_up(D, 128)
    assert D_pad % heads == 0, "heads must divide the lane-padded model dim"
    dh_pad = D_pad // heads
    out_dim = params["decoder"]["w2"].shape[1]
    O_pad = _round_up(out_dim, 128)

    def head_spread_cols(w):
        # (D, D) -> (D_pad, D_pad): head h's true output cols land at lanes
        # [h*dh_pad, h*dh_pad + dh); pad rows/lanes zero.
        out = jnp.zeros((D_pad, D_pad), w.dtype)
        for h in range(heads):
            out = out.at[:D, h * dh_pad:h * dh_pad + dh].set(w[:, h * dh:(h + 1) * dh])
        return out

    def head_spread_bias(b):
        out = jnp.zeros((D_pad,), b.dtype)
        for h in range(heads):
            out = out.at[h * dh_pad:h * dh_pad + dh].set(b[h * dh:(h + 1) * dh])
        return out

    def head_spread_rows(w):
        # W_O: (D, D) -> (D_pad, D_pad): head h's true rows land at
        # [h*dh_pad, h*dh_pad + dh), matching the lane-concatenated context.
        out = jnp.zeros((D_pad, D_pad), w.dtype)
        for h in range(heads):
            out = out.at[h * dh_pad:h * dh_pad + dh, :D].set(w[h * dh:(h + 1) * dh, :])
        return out

    bf = lambda a: a.astype(jnp.bfloat16)
    row = lambda v: _pad1(v, D_pad)[None, :]

    wqkv = jnp.stack([
        bf(jnp.concatenate([head_spread_cols(lp["wq"]),
                            head_spread_cols(lp["wk"]),
                            head_spread_cols(lp["wv"])], axis=1))
        for lp in layers], 0)                              # (L, Dp, 3*Dp) bf16
    bqkv = jnp.stack([
        jnp.concatenate([head_spread_bias(lp["bq"]),
                         head_spread_bias(lp["bk"]),
                         head_spread_bias(lp["bv"])], 0)[None, :]
        for lp in layers], 0)                              # (L, 1, 3*Dp) f32

    packed = dict(
        wqkv=wqkv, bqkv=bqkv,
        wo=jnp.stack([bf(head_spread_rows(lp["wo"])) for lp in layers], 0),
        bo=jnp.stack([row(lp["bo"]) for lp in layers], 0),
        wg=jnp.stack([jnp.stack([_pad1(lp["wgq"][:, 0], D_pad),
                                 _pad1(lp["wgc"][:, 0], D_pad)], 0)
                      for lp in layers], 0),
        bgc=jnp.stack([lp["bgc"].reshape(1, 1) for lp in layers], 0),
        w1=jnp.stack([bf(_pad2(lp["w1"], D_pad, D_pad)) for lp in layers], 0),
        b1=jnp.stack([row(lp["b1"]) for lp in layers], 0),
        gamma=jnp.stack([row(lp["gamma"]) for lp in layers], 0),
        beta=jnp.stack([row(lp["beta"]) for lp in layers], 0),
    )

    dec = params["decoder"]
    packed_dec = dict(
        dw1=bf(_pad2(dec["w1"], D_pad, D_pad)),
        db1=_pad1(dec["b1"], D_pad)[None, :],
        dw2=bf(_pad2(dec["w2"], D_pad, O_pad)),
        db2=_pad1(dec["b2"], O_pad)[None, :],
    )

    emb = params["embed"]
    packed_emb = dict(
        we=_pad2(emb["we"], emb["we"].shape[0], D_pad),
        be=_pad1(emb["be"], D_pad),
        time_tab=_pad2(emb["time_tab"], emb["time_tab"].shape[0], D_pad),
        week_tab=_pad2(emb["week_tab"], emb["week_tab"].shape[0], D_pad),
    )

    meta = dict(D=D, D_pad=D_pad, dh=dh, dh_pad=dh_pad,
                out_dim=out_dim, O_pad=O_pad, L=L, heads=heads)
    return packed, packed_dec, packed_emb, meta


def prepare_mask(mask, n_pad):
    """Pad the (N, N) additive mask to (Np, Np); padded keys are blocked
    (-1e9, exact after the f32 row-max subtraction); padded query rows only
    self-attend (their outputs are discarded)."""
    N = mask.shape[0]
    m = mask.astype(jnp.float32)
    if n_pad == N:
        return m
    full = jnp.full((n_pad, n_pad), -1e9, jnp.float32)
    full = full.at[:N, :N].set(m)
    idx = jnp.arange(n_pad)
    full = jnp.where((idx[:, None] == idx[None, :]) & (idx[:, None] >= N),
                     0.0, full)
    return full


# -----------------------------------------------------------------------------
# pallas_call wrapper
# -----------------------------------------------------------------------------
def gaat_fused_forward(x, packed, packed_dec, mask_p, meta, batch_block,
                       vmem_limit):
    """x: (B, Np, D_pad) f32 embedded input (pad rows/lanes zero)."""
    B, Np, D_pad = x.shape
    Bt = batch_block
    assert B % Bt == 0
    Mb = Bt * Np
    L, heads = meta["L"], meta["heads"]
    O_pad = meta["O_pad"]

    x2 = x.reshape(B * Np, D_pad)            # lane-dense 2-D slab; block = Mb rows

    lmap3 = lambda b, l: (l, 0, 0)           # per-layer stacked weights
    bmap = lambda b, l: (b, 0)               # per-batch-block activations/outputs
    cmap = lambda b, l: (0, 0)               # grid-invariant inputs

    in_specs = [
        pl.BlockSpec((Mb, D_pad), bmap),                    # x (flat rows)
        pl.BlockSpec((Np, Np), cmap),                       # additive mask (small)
        pl.BlockSpec((None, D_pad, 3 * D_pad), lmap3),      # fused Wqkv (bf16)
        pl.BlockSpec((None, 1, 3 * D_pad), lmap3),          # fused bqkv
        pl.BlockSpec((None, D_pad, D_pad), lmap3),          # Wo (bf16)
        pl.BlockSpec((None, 1, D_pad), lmap3),              # bo
        pl.BlockSpec((None, 2, D_pad), lmap3),              # gate weight rows
        pl.BlockSpec((None, 1, 1), lmap3),                  # gate bias
        pl.BlockSpec((None, D_pad, D_pad), lmap3),          # ResMLP W1 (bf16)
        pl.BlockSpec((None, 1, D_pad), lmap3),              # b1
        pl.BlockSpec((None, 1, D_pad), lmap3),              # gamma
        pl.BlockSpec((None, 1, D_pad), lmap3),              # beta
        pl.BlockSpec((D_pad, D_pad), cmap),                 # decoder w1
        pl.BlockSpec((1, D_pad), cmap),                     # decoder b1
        pl.BlockSpec((D_pad, O_pad), cmap),                 # decoder w2
        pl.BlockSpec((1, O_pad), cmap),                     # decoder b2
    ]

    kernel = functools.partial(gaat_fused_kernel, heads=heads, bt=Bt,
                               n_pad=Np, dh_real=meta["dh"], d_real=meta["D"])

    out2 = pl.pallas_call(
        kernel,
        out_shape=jax.ShapeDtypeStruct((B * Np, O_pad), jnp.float32),
        grid=(B // Bt, L),
        in_specs=in_specs,
        out_specs=pl.BlockSpec((Mb, O_pad), bmap),
        scratch_shapes=[pltpu.VMEM((Mb, D_pad), jnp.float32)],
        compiler_params=pltpu.CompilerParams(
            # Layer axis MUST stay last and "arbitrary": xs carries the
            # activation across it and out_ref is only written on its final step.
            dimension_semantics=("parallel", "arbitrary"),
            vmem_limit_bytes=vmem_limit),
    )(x2, mask_p,
      packed["wqkv"], packed["bqkv"], packed["wo"], packed["bo"],
      packed["wg"], packed["bgc"], packed["w1"], packed["b1"],
      packed["gamma"], packed["beta"],
      packed_dec["dw1"], packed_dec["db1"], packed_dec["dw2"], packed_dec["db2"])

    return out2.reshape(B, Np, O_pad)


def gaat_forward(params, data, time, weekday, mask, heads, batch_block=None):
    B, N, _ = data.shape
    Np = _round_up(N, 8)
    cap = _vmem_capacity_bytes()
    if batch_block is None:
        batch_block = _pick_batch_block(B, Np, cap)
    vmem_limit = _pick_vmem_limit(cap)

    packed, packed_dec, packed_emb, meta = prepare_fused_inputs(params, heads)
    mask_p = prepare_mask(mask, Np)

    # Embedding (plain-JAX glue): data projection + temporal lookups, lane-padded.
    x = jnp.einsum("bni,id->bnd", data, packed_emb["we"]) + packed_emb["be"]
    x = x + packed_emb["time_tab"][time][:, None, :]
    x = x + packed_emb["week_tab"][weekday][:, None, :]
    x = x.astype(jnp.float32)
    if Np != N:
        x = jnp.pad(x, ((0, 0), (0, Np - N), (0, 0)))

    out = gaat_fused_forward(x, packed, packed_dec, mask_p, meta,
                             batch_block, vmem_limit)
    return out[:, :N, : meta["out_dim"]]


# -----------------------------------------------------------------------------
# Parameter init (deterministic) and a plain-JAX f32 reference for validation
# -----------------------------------------------------------------------------
def init_params(key, model_dim, out_dim, num_layers, heads, in_dim,
                n_time_slots=288, n_weekdays=7):
    D = model_dim
    keys = iter(jax.random.split(key, 8 + num_layers * 16))
    nk = lambda: next(keys)
    glorot = lambda k, shp: (jax.random.normal(k, shp, jnp.float32)
                             * (2.0 / (shp[0] + shp[-1])) ** 0.5)
    small = lambda k, shp: 0.1 * jax.random.normal(k, shp, jnp.float32)

    params = {
        "embed": {
            "we": glorot(nk(), (in_dim, D)), "be": small(nk(), (D,)),
            "time_tab": 0.02 * jax.random.normal(nk(), (n_time_slots, D), jnp.float32),
            "week_tab": 0.02 * jax.random.normal(nk(), (n_weekdays, D), jnp.float32),
        },
        "layers": [],
        "decoder": {
            "w1": glorot(nk(), (D, D)), "b1": small(nk(), (D,)),
            "w2": glorot(nk(), (D, out_dim)), "b2": small(nk(), (out_dim,)),
        },
    }
    for _ in range(num_layers):
        lp = {
            "wq": glorot(nk(), (D, D)), "bq": small(nk(), (D,)),
            "wk": glorot(nk(), (D, D)), "bk": small(nk(), (D,)),
            "wv": glorot(nk(), (D, D)), "bv": small(nk(), (D,)),
            "wo": glorot(nk(), (D, D)), "bo": small(nk(), (D,)),
            "wgq": glorot(nk(), (D, 1)),                      # fc_q_gate (bias=False)
            "wgc": glorot(nk(), (D, 1)), "bgc": small(nk(), (1,)),
            "w1": glorot(nk(), (D, D)), "b1": small(nk(), (D,)),
            "gamma": 1.0 + small(nk(), (D,)), "beta": small(nk(), (D,)),
        }
        params["layers"].append(lp)
    return params


def reference_forward(params, data, time, weekday, mask, heads):
    """Plain-JAX f32 reference with identical module semantics."""
    e = params["embed"]
    x = jnp.einsum("bni,id->bnd", data, e["we"]) + e["be"]
    x = x + e["time_tab"][time][:, None, :] + e["week_tab"][weekday][:, None, :]
    B, N, D = x.shape
    dh = D // heads
    for lp in params["layers"]:
        q = x @ lp["wq"] + lp["bq"]
        k = x @ lp["wk"] + lp["bk"]
        v = x @ lp["wv"] + lp["bv"]
        qh = q.reshape(B, N, heads, dh).transpose(0, 2, 1, 3)
        kh = k.reshape(B, N, heads, dh).transpose(0, 2, 1, 3)
        vh = v.reshape(B, N, heads, dh).transpose(0, 2, 1, 3)
        s = jnp.einsum("bhnd,bhmd->bhnm", qh, kh) / (dh ** 0.5) + mask
        p = jax.nn.softmax(s, axis=-1)
        ctx = jnp.einsum("bhnm,bhmd->bhnd", p, vh).transpose(0, 2, 1, 3).reshape(B, N, D)
        context = ctx @ lp["wo"] + lp["bo"]
        gate = jax.nn.sigmoid(x @ lp["wgq"] + context @ lp["wgc"] + lp["bgc"])
        fusion = x * gate + context * (1.0 - gate)
        hid = fusion + jax.nn.relu(fusion @ lp["w1"] + lp["b1"])
        mu = jnp.mean(hid, axis=-1, keepdims=True)
        var = jnp.mean((hid - mu) ** 2, axis=-1, keepdims=True)
        x = (hid - mu) * jax.lax.rsqrt(var + 1e-5) * lp["gamma"] + lp["beta"]
    d = params["decoder"]
    z = jax.nn.relu(x @ d["w1"] + d["b1"])
    return z @ d["w2"] + d["b2"]


# -----------------------------------------------------------------------------
if __name__ == "__main__":
    B, N, D = 2, 8, 32
    heads, num_layers, out_dim, in_dim = 4, 2, 16, 4

    key = jax.random.PRNGKey(0)
    k_par, k_dat = jax.random.split(key)
    params = init_params(k_par, D, out_dim, num_layers, heads, in_dim)

    data = jax.random.normal(k_dat, (B, N, in_dim), jnp.float32)
    time = jnp.array([12, 100], jnp.int32)
    weekday = jnp.array([1, 5], jnp.int32)

    # Deterministic banded additive mask (0 = attend, -1e9 = blocked), like a
    # registered graph-adjacency buffer in GAATEncoder.
    idx = jnp.arange(N)
    allowed = jnp.abs(idx[:, None] - idx[None, :]) <= 2
    mask = jnp.where(allowed, 0.0, -1e9).astype(jnp.float32)

    out = gaat_forward(params, data, time, weekday, mask, heads)
    out = jax.block_until_ready(out)

    assert out.shape == (B, N, out_dim)
    assert bool(jnp.all(jnp.isfinite(out)))

    # Validate against the f32 reference (tolerance covers bf16 MXU operands
    # and the approximate softmax reciprocal).
    ref = reference_forward(params, data, time, weekday, mask, heads)
    err = float(jnp.max(jnp.abs(out - ref)))
    assert err < 1.5e-1, f"mismatch vs reference: max|diff|={err}"

    print("KERNEL_OK")
</pallas_src>

<mosaic_0001>
module attributes {stable_mosaic.version = 11 : i64} {
  func.func @gaat_fused_kernel(%arg0: i32, %arg1: i32, %arg2: memref<8x128xf32, #tpu.memory_space<vmem>>, %arg3: memref<8x8xf32, #tpu.memory_space<vmem>>, %arg4: memref<1x128x384xbf16, #tpu.memory_space<vmem>>, %arg5: memref<1x1x384xf32, #tpu.memory_space<vmem>>, %arg6: memref<1x128x128xbf16, #tpu.memory_space<vmem>>, %arg7: memref<1x1x128xf32, #tpu.memory_space<vmem>>, %arg8: memref<1x2x128xf32, #tpu.memory_space<vmem>>, %arg9: memref<1x1x1xf32, #tpu.memory_space<vmem>>, %arg10: memref<1x128x128xbf16, #tpu.memory_space<vmem>>, %arg11: memref<1x1x128xf32, #tpu.memory_space<vmem>>, %arg12: memref<1x1x128xf32, #tpu.memory_space<vmem>>, %arg13: memref<1x1x128xf32, #tpu.memory_space<vmem>>, %arg14: memref<128x128xbf16, #tpu.memory_space<vmem>>, %arg15: memref<1x128xf32, #tpu.memory_space<vmem>>, %arg16: memref<128x128xbf16, #tpu.memory_space<vmem>>, %arg17: memref<1x128xf32, #tpu.memory_space<vmem>>, %arg18: memref<8x128xf32, #tpu.memory_space<vmem>>, %arg19: memref<8x128xf32, #tpu.memory_space<vmem>>) attributes {dimension_semantics = [#tpu.dimension_semantics<parallel>, #tpu.dimension_semantics<arbitrary>], iteration_bounds = array<i64: 2, 2>, scalar_prefetch = 0 : i64, scratch_operands = 1 : i64, tpu.core_type = #tpu.core_type<tc>, window_params = [{transform_indices = @transform_0, window_bounds = array<i64: 8, 128>}, {pipeline_mode = #tpu.pipeline_mode<synchronous>, transform_indices = @transform_1, window_bounds = array<i64: 8, 8>}, {transform_indices = @transform_2, window_bounds = array<i64: 1, 128, 384>}, {transform_indices = @transform_3, window_bounds = array<i64: 1, 1, 384>}, {transform_indices = @transform_4, window_bounds = array<i64: 1, 128, 128>}, {transform_indices = @transform_5, window_bounds = array<i64: 1, 1, 128>}, {transform_indices = @transform_6, window_bounds = array<i64: 1, 2, 128>}, {transform_indices = @transform_7, window_bounds = array<i64: 1, 1, 1>}, {transform_indices = @transform_8, window_bounds = array<i64: 1, 128, 128>}, {transform_indices = @transform_9, window_bounds = array<i64: 1, 1, 128>}, {transform_indices = @transform_10, window_bounds = array<i64: 1, 1, 128>}, {transform_indices = @transform_11, window_bounds = array<i64: 1, 1, 128>}, {pipeline_mode = #tpu.pipeline_mode<synchronous>, transform_indices = @transform_12, window_bounds = array<i64: 128, 128>}, {pipeline_mode = #tpu.pipeline_mode<synchronous>, transform_indices = @transform_13, window_bounds = array<i64: 1, 128>}, {pipeline_mode = #tpu.pipeline_mode<synchronous>, transform_indices = @transform_14, window_bounds = array<i64: 128, 128>}, {pipeline_mode = #tpu.pipeline_mode<synchronous>, transform_indices = @transform_15, window_bounds = array<i64: 1, 128>}, {transform_indices = @transform_16, window_bounds = array<i64: 8, 128>}]} {
    %c0_i32 = arith.constant 0 : i32
    %0 = arith.cmpi eq, %arg1, %c0_i32 : i32
    %1 = arith.extui %0 : i1 to i32
    %c0_i32_0 = arith.constant 0 : i32
    %2 = arith.cmpi ne, %1, %c0_i32_0 : i32
    scf.if %2 {
      %c0_68 = arith.constant 0 : index
      %c0_69 = arith.constant 0 : index
      %205 = vector.load %arg2[%c0_68, %c0_69] : memref<8x128xf32, #tpu.memory_space<vmem>>, vector<8x128xf32>
      %c0_70 = arith.constant 0 : index
      %c0_71 = arith.constant 0 : index
      %206 = vector.load %arg19[%c0_70, %c0_71] : memref<8x128xf32, #tpu.memory_space<vmem>>, vector<8x128xf32>
      tpu.vector_store %arg19[%c0_70, %c0_71], %205 {strides = array<i32>} : memref<8x128xf32, #tpu.memory_space<vmem>>, vector<8x128xf32>,
    } else {
    }
    %c0 = arith.constant 0 : index
    %c0_1 = arith.constant 0 : index
    %3 = vector.load %arg19[%c0, %c0_1] : memref<8x128xf32, #tpu.memory_space<vmem>>, vector<8x128xf32>
    %4 = arith.truncf %3 : vector<8x128xf32> to vector<8x128xbf16>
    %c0_2 = arith.constant 0 : index
    %c0_3 = arith.constant 0 : index
    %c0_4 = arith.constant 0 : index
    %5 = vector.load %arg4[%c0_2, %c0_3, %c0_4] : memref<1x128x384xbf16, #tpu.memory_space<vmem>>, vector<1x128x384xbf16>
    %6 = vector.shape_cast %5 : vector<1x128x384xbf16> to vector<128x384xbf16>
    %cst = arith.constant dense<0.000000e+00> : vector<8x384xf32>
    %7 = tpu.matmul %4, %6, %cst {dimension_numbers = #tpu.dot_dimension_numbers<[1], [0], [0], [1], [0, 0, 1, 1], [], []>} : vector<8x128xbf16>, vector<128x384xbf16>, vector<8x384xf32> -> vector<8x384xf32>
    %c0_5 = arith.constant 0 : index
    %c0_6 = arith.constant 0 : index
    %c0_7 = arith.constant 0 : index
    %8 = vector.load %arg5[%c0_5, %c0_6, %c0_7] : memref<1x1x384xf32, #tpu.memory_space<vmem>>, vector<1x1x384xf32>
    %9 = vector.shape_cast %8 : vector<1x1x384xf32> to vector<1x384xf32>
    %10 = vector.broadcast %9 : vector<1x384xf32> to vector<8x384xf32>
    %11 = arith.addf %7, %10 : vector<8x384xf32>
    %c0_8 = arith.constant 0 : index
    %c0_9 = arith.constant 0 : index
    %12 = vector.load %arg3[%c0_8, %c0_9] : memref<8x8xf32, #tpu.memory_space<vmem>>, vector<8x8xf32>
    %13 = vector.extract_strided_slice %11 {offsets = [0, 0], sizes = [8, 32], strides = [1, 1]} : vector<8x384xf32> to vector<8x32xf32>
    %14 = vector.extract_strided_slice %11 {offsets = [0, 128], sizes = [8, 32], strides = [1, 1]} : vector<8x384xf32> to vector<8x32xf32>
    %15 = vector.extract_strided_slice %11 {offsets = [0, 256], sizes = [8, 32], strides = [1, 1]} : vector<8x384xf32> to vector<8x32xf32>
    %16 = arith.truncf %13 : vector<8x32xf32> to vector<8x32xbf16>
    %17 = vector.shape_cast %16 : vector<8x32xbf16> to vector<1x8x32xbf16>
    %18 = arith.truncf %14 : vector<8x32xf32> to vector<8x32xbf16>
    %19 = vector.shape_cast %18 : vector<8x32xbf16> to vector<1x8x32xbf16>
    %20 = arith.truncf %15 : vector<8x32xf32> to vector<8x32xbf16>
    %21 = vector.shape_cast %20 : vector<8x32xbf16> to vector<1x8x32xbf16>
    "tpu.trace_start"() <{level = 10 : i32, message = "bnk,bmk->bnm"}> : () -> ()
    %cst_10 = arith.constant dense<0.000000e+00> : vector<1x8x8xf32>
    %22 = tpu.matmul %17, %19, %cst_10 {dimension_numbers = #tpu.dot_dimension_numbers<[2], [2], [1], [1], [0, 0, 0, 1, 1, 1], [0], [0]>} : vector<1x8x32xbf16>, vector<1x8x32xbf16>, vector<1x8x8xf32> -> vector<1x8x8xf32>
    "tpu.trace_stop"() : () -> ()
    %cst_11 = arith.constant 0.353553385 : f32
    %23 = vector.broadcast %cst_11 : f32 to vector<1x8x8xf32>
    %24 = arith.mulf %22, %23 : vector<1x8x8xf32>
    %25 = vector.shape_cast %12 : vector<8x8xf32> to vector<1x8x8xf32>
    %26 = arith.addf %24, %25 : vector<1x8x8xf32>
    %cst_12 = arith.constant dense<0xFF800000> : vector<1x8xf32>
    %27 = vector.multi_reduction <maximumf>, %26, %cst_12 [2] : vector<1x8x8xf32> to vector<1x8xf32>
    %28 = vector.shape_cast %27 : vector<1x8xf32> to vector<1x8x1xf32>
    %29 = vector.broadcast %28 : vector<1x8x1xf32> to vector<1x8x8xf32>
    %30 = arith.subf %26, %29 : vector<1x8x8xf32>
    %31 = math.exp %30 : vector<1x8x8xf32>
    %cst_13 = arith.constant dense<0.000000e+00> : vector<1x8xf32>
    %32 = vector.multi_reduction <add>, %31, %cst_13 [2] : vector<1x8x8xf32> to vector<1x8xf32>
    %33 = vector.shape_cast %32 : vector<1x8xf32> to vector<1x8x1xf32>
    %34 = tpu.reciprocal %33 {approx = true} : vector<1x8x1xf32> -> vector<1x8x1xf32>
    %35 = vector.broadcast %34 : vector<1x8x1xf32> to vector<1x8x8xf32>
    %36 = arith.mulf %31, %35 : vector<1x8x8xf32>
    %37 = arith.truncf %36 : vector<1x8x8xf32> to vector<1x8x8xbf16>
    "tpu.trace_start"() <{level = 10 : i32, message = "bnm,bmk->bnk"}> : () -> ()
    %cst_14 = arith.constant dense<0.000000e+00> : vector<1x8x32xf32>
    %38 = tpu.matmul %37, %21, %cst_14 {dimension_numbers = #tpu.dot_dimension_numbers<[2], [1], [1], [2], [0, 0, 0, 1, 1, 2], [0], [0]>} : vector<1x8x8xbf16>, vector<1x8x32xbf16>, vector<1x8x32xf32> -> vector<1x8x32xf32>
    "tpu.trace_stop"() : () -> ()
    %39 = vector.shape_cast %38 : vector<1x8x32xf32> to vector<8x32xf32>
    %40 = vector.extract_strided_slice %11 {offsets = [0, 32], sizes = [8, 32], strides = [1, 1]} : vector<8x384xf32> to vector<8x32xf32>
    %41 = vector.extract_strided_slice %11 {offsets = [0, 160], sizes = [8, 32], strides = [1, 1]} : vector<8x384xf32> to vector<8x32xf32>
    %42 = vector.extract_strided_slice %11 {offsets = [0, 288], sizes = [8, 32], strides = [1, 1]} : vector<8x384xf32> to vector<8x32xf32>
    %43 = arith.truncf %40 : vector<8x32xf32> to vector<8x32xbf16>
    %44 = vector.shape_cast %43 : vector<8x32xbf16> to vector<1x8x32xbf16>
    %45 = arith.truncf %41 : vector<8x32xf32> to vector<8x32xbf16>
    %46 = vector.shape_cast %45 : vector<8x32xbf16> to vector<1x8x32xbf16>
    %47 = arith.truncf %42 : vector<8x32xf32> to vector<8x32xbf16>
    %48 = vector.shape_cast %47 : vector<8x32xbf16> to vector<1x8x32xbf16>
    "tpu.trace_start"() <{level = 10 : i32, message = "bnk,bmk->bnm"}> : () -> ()
    %cst_15 = arith.constant dense<0.000000e+00> : vector<1x8x8xf32>
    %49 = tpu.matmul %44, %46, %cst_15 {dimension_numbers = #tpu.dot_dimension_numbers<[2], [2], [1], [1], [0, 0, 0, 1, 1, 1], [0], [0]>} : vector<1x8x32xbf16>, vector<1x8x32xbf16>, vector<1x8x8xf32> -> vector<1x8x8xf32>
    "tpu.trace_stop"() : () -> ()
    %cst_16 = arith.constant 0.353553385 : f32
    %50 = vector.broadcast %cst_16 : f32 to vector<1x8x8xf32>
    %51 = arith.mulf %49, %50 : vector<1x8x8xf32>
    %52 = vector.shape_cast %12 : vector<8x8xf32> to vector<1x8x8xf32>
    %53 = arith.addf %51, %52 : vector<1x8x8xf32>
    %cst_17 = arith.constant dense<0xFF800000> : vector<1x8xf32>
    %54 = vector.multi_reduction <maximumf>, %53, %cst_17 [2] : vector<1x8x8xf32> to vector<1x8xf32>
    %55 = vector.shape_cast %54 : vector<1x8xf32> to vector<1x8x1xf32>
    %56 = vector.broadcast %55 : vector<1x8x1xf32> to vector<1x8x8xf32>
    %57 = arith.subf %53, %56 : vector<1x8x8xf32>
    %58 = math.exp %57 : vector<1x8x8xf32>
    %cst_18 = arith.constant dense<0.000000e+00> : vector<1x8xf32>
    %59 = vector.multi_reduction <add>, %58, %cst_18 [2] : vector<1x8x8xf32> to vector<1x8xf32>
    %60 = vector.shape_cast %59 : vector<1x8xf32> to vector<1x8x1xf32>
    %61 = tpu.reciprocal %60 {approx = true} : vector<1x8x1xf32> -> vector<1x8x1xf32>
    %62 = vector.broadcast %61 : vector<1x8x1xf32> to vector<1x8x8xf32>
    %63 = arith.mulf %58, %62 : vector<1x8x8xf32>
    %64 = arith.truncf %63 : vector<1x8x8xf32> to vector<1x8x8xbf16>
    "tpu.trace_start"() <{level = 10 : i32, message = "bnm,bmk->bnk"}> : () -> ()
    %cst_19 = arith.constant dense<0.000000e+00> : vector<1x8x32xf32>
    %65 = tpu.matmul %64, %48, %cst_19 {dimension_numbers = #tpu.dot_dimension_numbers<[2], [1], [1], [2], [0, 0, 0, 1, 1, 2], [0], [0]>} : vector<1x8x8xbf16>, vector<1x8x32xbf16>, vector<1x8x32xf32> -> vector<1x8x32xf32>
    "tpu.trace_stop"() : () -> ()
    %66 = vector.shape_cast %65 : vector<1x8x32xf32> to vector<8x32xf32>
    %67 = vector.extract_strided_slice %11 {offsets = [0, 64], sizes = [8, 32], strides = [1, 1]} : vector<8x384xf32> to vector<8x32xf32>
    %68 = vector.extract_strided_slice %11 {offsets = [0, 192], sizes = [8, 32], strides = [1, 1]} : vector<8x384xf32> to vector<8x32xf32>
    %69 = vector.extract_strided_slice %11 {offsets = [0, 320], sizes = [8, 32], strides = [1, 1]} : vector<8x384xf32> to vector<8x32xf32>
    %70 = arith.truncf %67 : vector<8x32xf32> to vector<8x32xbf16>
    %71 = vector.shape_cast %70 : vector<8x32xbf16> to vector<1x8x32xbf16>
    %72 = arith.truncf %68 : vector<8x32xf32> to vector<8x32xbf16>
    %73 = vector.shape_cast %72 : vector<8x32xbf16> to vector<1x8x32xbf16>
    %74 = arith.truncf %69 : vector<8x32xf32> to vector<8x32xbf16>
    %75 = vector.shape_cast %74 : vector<8x32xbf16> to vector<1x8x32xbf16>
    "tpu.trace_start"() <{level = 10 : i32, message = "bnk,bmk->bnm"}> : () -> ()
    %cst_20 = arith.constant dense<0.000000e+00> : vector<1x8x8xf32>
    %76 = tpu.matmul %71, %73, %cst_20 {dimension_numbers = #tpu.dot_dimension_numbers<[2], [2], [1], [1], [0, 0, 0, 1, 1, 1], [0], [0]>} : vector<1x8x32xbf16>, vector<1x8x32xbf16>, vector<1x8x8xf32> -> vector<1x8x8xf32>
    "tpu.trace_stop"() : () -> ()
    %cst_21 = arith.constant 0.353553385 : f32
    %77 = vector.broadcast %cst_21 : f32 to vector<1x8x8xf32>
    %78 = arith.mulf %76, %77 : vector<1x8x8xf32>
    %79 = vector.shape_cast %12 : vector<8x8xf32> to vector<1x8x8xf32>
    %80 = arith.addf %78, %79 : vector<1x8x8xf32>
    %cst_22 = arith.constant dense<0xFF800000> : vector<1x8xf32>
    %81 = vector.multi_reduction <maximumf>, %80, %cst_22 [2] : vector<1x8x8xf32> to vector<1x8xf32>
    %82 = vector.shape_cast %81 : vector<1x8xf32> to vector<1x8x1xf32>
    %83 = vector.broadcast %82 : vector<1x8x1xf32> to vector<1x8x8xf32>
    %84 = arith.subf %80, %83 : vector<1x8x8xf32>
    %85 = math.exp %84 : vector<1x8x8xf32>
    %cst_23 = arith.constant dense<0.000000e+00> : vector<1x8xf32>
    %86 = vector.multi_reduction <add>, %85, %cst_23 [2] : vector<1x8x8xf32> to vector<1x8xf32>
    %87 = vector.shape_cast %86 : vector<1x8xf32> to vector<1x8x1xf32>
    %88 = tpu.reciprocal %87 {approx = true} : vector<1x8x1xf32> -> vector<1x8x1xf32>
    %89 = vector.broadcast %88 : vector<1x8x1xf32> to vector<1x8x8xf32>
    %90 = arith.mulf %85, %89 : vector<1x8x8xf32>
    %91 = arith.truncf %90 : vector<1x8x8xf32> to vector<1x8x8xbf16>
    "tpu.trace_start"() <{level = 10 : i32, message = "bnm,bmk->bnk"}> : () -> ()
    %cst_24 = arith.constant dense<0.000000e+00> : vector<1x8x32xf32>
    %92 = tpu.matmul %91, %75, %cst_24 {dimension_numbers = #tpu.dot_dimension_numbers<[2], [1], [1], [2], [0, 0, 0, 1, 1, 2], [0], [0]>} : vector<1x8x8xbf16>, vector<1x8x32xbf16>, vector<1x8x32xf32> -> vector<1x8x32xf32>
    "tpu.trace_stop"() : () -> ()
    %93 = vector.shape_cast %92 : vector<1x8x32xf32> to vector<8x32xf32>
    %94 = vector.extract_strided_slice %11 {offsets = [0, 96], sizes = [8, 32], strides = [1, 1]} : vector<8x384xf32> to vector<8x32xf32>
    %95 = vector.extract_strided_slice %11 {offsets = [0, 224], sizes = [8, 32], strides = [1, 1]} : vector<8x384xf32> to vector<8x32xf32>
    %96 = vector.extract_strided_slice %11 {offsets = [0, 352], sizes = [8, 32], strides = [1, 1]} : vector<8x384xf32> to vector<8x32xf32>
    %97 = arith.truncf %94 : vector<8x32xf32> to vector<8x32xbf16>
    %98 = vector.shape_cast %97 : vector<8x32xbf16> to vector<1x8x32xbf16>
    %99 = arith.truncf %95 : vector<8x32xf32> to vector<8x32xbf16>
    %100 = vector.shape_cast %99 : vector<8x32xbf16> to vector<1x8x32xbf16>
    %101 = arith.truncf %96 : vector<8x32xf32> to vector<8x32xbf16>
    %102 = vector.shape_cast %101 : vector<8x32xbf16> to vector<1x8x32xbf16>
    "tpu.trace_start"() <{level = 10 : i32, message = "bnk,bmk->bnm"}> : () -> ()
    %cst_25 = arith.constant dense<0.000000e+00> : vector<1x8x8xf32>
    %103 = tpu.matmul %98, %100, %cst_25 {dimension_numbers = #tpu.dot_dimension_numbers<[2], [2], [1], [1], [0, 0, 0, 1, 1, 1], [0], [0]>} : vector<1x8x32xbf16>, vector<1x8x32xbf16>, vector<1x8x8xf32> -> vector<1x8x8xf32>
    "tpu.trace_stop"() : () -> ()
    %cst_26 = arith.constant 0.353553385 : f32
    %104 = vector.broadcast %cst_26 : f32 to vector<1x8x8xf32>
    %105 = arith.mulf %103, %104 : vector<1x8x8xf32>
    %106 = vector.shape_cast %12 : vector<8x8xf32> to vector<1x8x8xf32>
    %107 = arith.addf %105, %106 : vector<1x8x8xf32>
    %cst_27 = arith.constant dense<0xFF800000> : vector<1x8xf32>
    %108 = vector.multi_reduction <maximumf>, %107, %cst_27 [2] : vector<1x8x8xf32> to vector<1x8xf32>
    %109 = vector.shape_cast %108 : vector<1x8xf32> to vector<1x8x1xf32>
    %110 = vector.broadcast %109 : vector<1x8x1xf32> to vector<1x8x8xf32>
    %111 = arith.subf %107, %110 : vector<1x8x8xf32>
    %112 = math.exp %111 : vector<1x8x8xf32>
    %cst_28 = arith.constant dense<0.000000e+00> : vector<1x8xf32>
    %113 = vector.multi_reduction <add>, %112, %cst_28 [2] : vector<1x8x8xf32> to vector<1x8xf32>
    %114 = vector.shape_cast %113 : vector<1x8xf32> to vector<1x8x1xf32>
    %115 = tpu.reciprocal %114 {approx = true} : vector<1x8x1xf32> -> vector<1x8x1xf32>
    %116 = vector.broadcast %115 : vector<1x8x1xf32> to vector<1x8x8xf32>
    %117 = arith.mulf %112, %116 : vector<1x8x8xf32>
    %118 = arith.truncf %117 : vector<1x8x8xf32> to vector<1x8x8xbf16>
    "tpu.trace_start"() <{level = 10 : i32, message = "bnm,bmk->bnk"}> : () -> ()
    %cst_29 = arith.constant dense<0.000000e+00> : vector<1x8x32xf32>
    %119 = tpu.matmul %118, %102, %cst_29 {dimension_numbers = #tpu.dot_dimension_numbers<[2], [1], [1], [2], [0, 0, 0, 1, 1, 2], [0], [0]>} : vector<1x8x8xbf16>, vector<1x8x32xbf16>, vector<1x8x32xf32> -> vector<1x8x32xf32>
    "tpu.trace_stop"() : () -> ()
    %120 = vector.shape_cast %119 : vector<1x8x32xf32> to vector<8x32xf32>
    %121 = tpu.concatenate %39, %66, %93, %120 in 1 : vector<8x32xf32>, vector<8x32xf32>, vector<8x32xf32>, vector<8x32xf32> -> vector<8x128xf32>
    %122 = arith.truncf %121 : vector<8x128xf32> to vector<8x128xbf16>
    %c0_30 = arith.constant 0 : index
    %c0_31 = arith.constant 0 : index
    %c0_32 = arith.constant 0 : index
    %123 = vector.load %arg6[%c0_30, %c0_31, %c0_32] : memref<1x128x128xbf16, #tpu.memory_space<vmem>>, vector<1x128x128xbf16>
    %124 = vector.shape_cast %123 : vector<1x128x128xbf16> to vector<128x128xbf16>
    %cst_33 = arith.constant dense<0.000000e+00> : vector<8x128xf32>
    %125 = tpu.matmul %122, %124, %cst_33 {dimension_numbers = #tpu.dot_dimension_numbers<[1], [0], [0], [1], [0, 0, 1, 1], [], []>} : vector<8x128xbf16>, vector<128x128xbf16>, vector<8x128xf32> -> vector<8x128xf32>
    %c0_34 = arith.constant 0 : index
    %c0_35 = arith.constant 0 : index
    %c0_36 = arith.constant 0 : index
    %126 = vector.load %arg7[%c0_34, %c0_35, %c0_36] : memref<1x1x128xf32, #tpu.memory_space<vmem>>, vector<1x1x128xf32>
    %127 = vector.shape_cast %126 : vector<1x1x128xf32> to vector<1x128xf32>
    %128 = vector.broadcast %127 : vector<1x128xf32> to vector<8x128xf32>
    %129 = arith.addf %125, %128 : vector<8x128xf32>
    %c0_37 = arith.constant 0 : index
    %c0_38 = arith.constant 0 : index
    %c0_39 = arith.constant 0 : index
    %130 = vector.load %arg8[%c0_37, %c0_38, %c0_39] : memref<1x2x128xf32, #tpu.memory_space<vmem>>, vector<1x2x128xf32>
    %131 = vector.shape_cast %130 : vector<1x2x128xf32> to vector<2x128xf32>
    %132 = vector.extract_strided_slice %131 {offsets = [0, 0], sizes = [1, 128], strides = [1, 1]} : vector<2x128xf32> to vector<1x128xf32>
    %133 = vector.broadcast %132 : vector<1x128xf32> to vector<8x128xf32>
    %134 = arith.mulf %3, %133 : vector<8x128xf32>
    %135 = vector.extract_strided_slice %131 {offsets = [1, 0], sizes = [1, 128], strides = [1, 1]} : vector<2x128xf32> to vector<1x128xf32>
    %136 = vector.broadcast %135 : vector<1x128xf32> to vector<8x128xf32>
    %137 = arith.mulf %129, %136 : vector<8x128xf32>
    %138 = arith.addf %134, %137 : vector<8x128xf32>
    %cst_40 = arith.constant dense<0.000000e+00> : vector<8xf32>
    %139 = vector.multi_reduction <add>, %138, %cst_40 [1] : vector<8x128xf32> to vector<8xf32>
    %140 = vector.shape_cast %139 : vector<8xf32> to vector<8x1xf32>
    %c0_41 = arith.constant 0 : index
    %c0_42 = arith.constant 0 : index
    %c0_43 = arith.constant 0 : index
    %141 = vector.load %arg9[%c0_41, %c0_42, %c0_43] : memref<1x1x1xf32, #tpu.memory_space<vmem>>, vector<1x1x1xf32>
    %142 = vector.shape_cast %141 : vector<1x1x1xf32> to vector<1x1xf32>
    %143 = vector.broadcast %142 : vector<1x1xf32> to vector<8x1xf32>
    %144 = arith.addf %140, %143 : vector<8x1xf32>
    %145 = arith.negf %144 : vector<8x1xf32>
    %146 = math.exp %145 : vector<8x1xf32>
    %cst_44 = arith.constant 1.000000e+00 : f32
    %147 = vector.broadcast %cst_44 : f32 to vector<8x1xf32>
    %148 = arith.addf %147, %146 : vector<8x1xf32>
    %149 = arith.divf %147, %148 : vector<8x1xf32>
    %150 = vector.broadcast %149 : vector<8x1xf32> to vector<8x128xf32>
    %151 = arith.mulf %3, %150 : vector<8x128xf32>
    %cst_45 = arith.constant 1.000000e+00 : f32
    %152 = vector.broadcast %cst_45 : f32 to vector<8x1xf32>
    %153 = arith.subf %152, %149 : vector<8x1xf32>
    %154 = vector.broadcast %153 : vector<8x1xf32> to vector<8x128xf32>
    %155 = arith.mulf %129, %154 : vector<8x128xf32>
    %156 = arith.addf %151, %155 : vector<8x128xf32>
    %157 = arith.truncf %156 : vector<8x128xf32> to vector<8x128xbf16>
    %c0_46 = arith.constant 0 : index
    %c0_47 = arith.constant 0 : index
    %c0_48 = arith.constant 0 : index
    %158 = vector.load %arg10[%c0_46, %c0_47, %c0_48] : memref<1x128x128xbf16, #tpu.memory_space<vmem>>, vector<1x128x128xbf16>
    %159 = vector.shape_cast %158 : vector<1x128x128xbf16> to vector<128x128xbf16>
    %cst_49 = arith.constant dense<0.000000e+00> : vector<8x128xf32>
    %160 = tpu.matmul %157, %159, %cst_49 {dimension_numbers = #tpu.dot_dimension_numbers<[1], [0], [0], [1], [0, 0, 1, 1], [], []>} : vector<8x128xbf16>, vector<128x128xbf16>, vector<8x128xf32> -> vector<8x128xf32>
    %c0_50 = arith.constant 0 : index
    %c0_51 = arith.constant 0 : index
    %c0_52 = arith.constant 0 : index
    %161 = vector.load %arg11[%c0_50, %c0_51, %c0_52] : memref<1x1x128xf32, #tpu.memory_space<vmem>>, vector<1x1x128xf32>
    %162 = vector.shape_cast %161 : vector<1x1x128xf32> to vector<1x128xf32>
    %163 = vector.broadcast %162 : vector<1x128xf32> to vector<8x128xf32>
    %164 = arith.addf %160, %163 : vector<8x128xf32>
    %cst_53 = arith.constant 0.000000e+00 : f32
    %165 = vector.broadcast %cst_53 : f32 to vector<8x128xf32>
    %166 = arith.maximumf %164, %165 : vector<8x128xf32>
    %167 = arith.addf %156, %166 : vector<8x128xf32>
    %168 = tpu.iota {dimensions = array<i32: 1>} : vector<1x128xi32>
    %c32_i32 = arith.constant 32 : i32
    %169 = vector.broadcast %c32_i32 : i32 to vector<1x128xi32>
    %170 = arith.cmpi slt, %168, %169 : vector<1x128xi32>
    %171 = arith.extui %170 : vector<1x128xi1> to vector<1x128xi32>
    %172 = arith.sitofp %171 : vector<1x128xi32> to vector<1x128xf32>
    %173 = vector.broadcast %172 : vector<1x128xf32> to vector<8x128xf32>
    %174 = arith.mulf %167, %173 : vector<8x128xf32>
    %cst_54 = arith.constant dense<0.000000e+00> : vector<8xf32>
    %175 = vector.multi_reduction <add>, %174, %cst_54 [1] : vector<8x128xf32> to vector<8xf32>
    %176 = vector.shape_cast %175 : vector<8xf32> to vector<8x1xf32>
    %cst_55 = arith.constant 3.125000e-02 : f32
    %177 = vector.broadcast %cst_55 : f32 to vector<8x1xf32>
    %178 = arith.mulf %176, %177 : vector<8x1xf32>
    %179 = vector.broadcast %178 : vector<8x1xf32> to vector<8x128xf32>
    %180 = arith.subf %167, %179 : vector<8x128xf32>
    %181 = vector.broadcast %172 : vector<1x128xf32> to vector<8x128xf32>
    %182 = arith.mulf %180, %181 : vector<8x128xf32>
    %183 = arith.mulf %182, %182 : vector<8x128xf32>
    %cst_56 = arith.constant dense<0.000000e+00> : vector<8xf32>
    %184 = vector.multi_reduction <add>, %183, %cst_56 [1] : vector<8x128xf32> to vector<8xf32>
    %185 = vector.shape_cast %184 : vector<8xf32> to vector<8x1xf32>
    %cst_57 = arith.constant 3.125000e-02 : f32
    %186 = vector.broadcast %cst_57 : f32 to vector<8x1xf32>
    %187 = arith.mulf %185, %186 : vector<8x1xf32>
    %cst_58 = arith.constant 9.99999974E-6 : f32
    %188 = vector.broadcast %cst_58 : f32 to vector<8x1xf32>
    %189 = arith.addf %187, %188 : vector<8x1xf32>
    %190 = math.rsqrt %189 : vector<8x1xf32>
    %191 = vector.broadcast %190 : vector<8x1xf32> to vector<8x128xf32>
    %192 = arith.mulf %182, %191 : vector<8x128xf32>
    %c0_59 = arith.constant 0 : index
    %c0_60 = arith.constant 0 : index
    %c0_61 = arith.constant 0 : index
    %193 = vector.load %arg12[%c0_59, %c0_60, %c0_61] : memref<1x1x128xf32, #tpu.memory_space<vmem>>, vector<1x1x128xf32>
    %194 = vector.shape_cast %193 : vector<1x1x128xf32> to vector<1x128xf32>
    %195 = vector.broadcast %194 : vector<1x128xf32> to vector<8x128xf32>
    %196 = arith.mulf %192, %195 : vector<8x128xf32>
    %c0_62 = arith.constant 0 : index
    %c0_63 = arith.constant 0 : index
    %c0_64 = arith.constant 0 : index
    %197 = vector.load %arg13[%c0_62, %c0_63, %c0_64] : memref<1x1x128xf32, #tpu.memory_space<vmem>>, vector<1x1x128xf32>
    %198 = vector.shape_cast %197 : vector<1x1x128xf32> to vector<1x128xf32>
    %199 = vector.broadcast %198 : vector<1x128xf32> to vector<8x128xf32>
    %200 = arith.addf %196, %199 : vector<8x128xf32>
    %c0_65 = arith.constant 0 : index
    %c0_66 = arith.constant 0 : index
    %201 = vector.load %arg19[%c0_65, %c0_66] : memref<8x128xf32, #tpu.memory_space<vmem>>, vector<8x128xf32>
    tpu.vector_store %arg19[%c0_65, %c0_66], %200 {strides = array<i32>} : memref<8x128xf32, #tpu.memory_space<vmem>>, vector<8x128xf32>,
    %c1_i32 = arith.constant 1 : i32
    %202 = arith.cmpi eq, %arg1, %c1_i32 : i32
    %203 = arith.extui %202 : i1 to i32
    %c0_i32_67 = arith.constant 0 : i32
    %204 = arith.cmpi ne, %203, %c0_i32_67 : i32
    scf.if %204 {
      %205 = arith.truncf %200 : vector<8x128xf32> to vector<8x128xbf16>
      %c0_68 = arith.constant 0 : index
      %c0_69 = arith.constant 0 : index
      %206 = vector.load %arg14[%c0_68, %c0_69] : memref<128x128xbf16, #tpu.memory_space<vmem>>, vector<128x128xbf16>
      %cst_70 = arith.constant dense<0.000000e+00> : vector<8x128xf32>
      %207 = tpu.matmul %205, %206, %cst_70 {dimension_numbers = #tpu.dot_dimension_numbers<[1], [0], [0], [1], [0, 0, 1, 1], [], []>} : vector<8x128xbf16>, vector<128x128xbf16>, vector<8x128xf32> -> vector<8x128xf32>
      %c0_71 = arith.constant 0 : index
      %c0_72 = arith.constant 0 : index
      %208 = vector.load %arg15[%c0_71, %c0_72] : memref<1x128xf32, #tpu.memory_space<vmem>>, vector<1x128xf32>
      %209 = vector.broadcast %208 : vector<1x128xf32> to vector<8x128xf32>
      %210 = arith.addf %207, %209 : vector<8x128xf32>
      %cst_73 = arith.constant 0.000000e+00 : f32
      %211 = vector.broadcast %cst_73 : f32 to vector<8x128xf32>
      %212 = arith.maximumf %210, %211 : vector<8x128xf32>
      %213 = arith.truncf %212 : vector<8x128xf32> to vector<8x128xbf16>
      %c0_74 = arith.constant 0 : index
      %c0_75 = arith.constant 0 : index
      %214 = vector.load %arg16[%c0_74, %c0_75] : memref<128x128xbf16, #tpu.memory_space<vmem>>, vector<128x128xbf16>
      %cst_76 = arith.constant dense<0.000000e+00> : vector<8x128xf32>
      %215 = tpu.matmul %213, %214, %cst_76 {dimension_numbers = #tpu.dot_dimension_numbers<[1], [0], [0], [1], [0, 0, 1, 1], [], []>} : vector<8x128xbf16>, vector<128x128xbf16>, vector<8x128xf32> -> vector<8x128xf32>
      %c0_77 = arith.constant 0 : index
      %c0_78 = arith.constant 0 : index
      %216 = vector.load %arg17[%c0_77, %c0_78] : memref<1x128xf32, #tpu.memory_space<vmem>>, vector<1x128xf32>
      %217 = vector.broadcast %216 : vector<1x128xf32> to vector<8x128xf32>
      %218 = arith.addf %215, %217 : vector<8x128xf32>
      %c0_79 = arith.constant 0 : index
      %c0_80 = arith.constant 0 : index
      %219 = vector.load %arg18[%c0_79, %c0_80] : memref<8x128xf32, #tpu.memory_space<vmem>>, vector<8x128xf32>
      tpu.vector_store %arg18[%c0_79, %c0_80], %218 {strides = array<i32>} : memref<8x128xf32, #tpu.memory_space<vmem>>, vector<8x128xf32>,
    } else {
    }
    return
  }
  func.func @transform_0(%arg0: i32, %arg1: i32) -> (i32, i32) {
    %c0_i32 = arith.constant 0 : i32
    %c0_i32_0 = arith.constant 0 : i32
    return %arg0, %c0_i32 : i32, i32
  }
  func.func @transform_1(%arg0: i32, %arg1: i32) -> (i32, i32) {
    %c0_i32 = arith.constant 0 : i32
    %c0_i32_0 = arith.constant 0 : i32
    %c0_i32_1 = arith.constant 0 : i32
    return %c0_i32, %c0_i32_0 : i32, i32
  }
  func.func @transform_2(%arg0: i32, %arg1: i32) -> (i32, i32, i32) {
    %c0_i32 = arith.constant 0 : i32
    %c0_i32_0 = arith.constant 0 : i32
    %c0_i32_1 = arith.constant 0 : i32
    return %arg1, %c0_i32, %c0_i32_0 : i32, i32, i32
  }
  func.func @transform_3(%arg0: i32, %arg1: i32) -> (i32, i32, i32) {
    %c0_i32 = arith.constant 0 : i32
    %c0_i32_0 = arith.constant 0 : i32
    %c0_i32_1 = arith.constant 0 : i32
    return %arg1, %c0_i32, %c0_i32_0 : i32, i32, i32
  }
  func.func @transform_4(%arg0: i32, %arg1: i32) -> (i32, i32, i32) {
    %c0_i32 = arith.constant 0 : i32
    %c0_i32_0 = arith.constant 0 : i32
    %c0_i32_1 = arith.constant 0 : i32
    return %arg1, %c0_i32, %c0_i32_0 : i32, i32, i32
  }
  func.func @transform_5(%arg0: i32, %arg1: i32) -> (i32, i32, i32) {
    %c0_i32 = arith.constant 0 : i32
    %c0_i32_0 = arith.constant 0 : i32
    %c0_i32_1 = arith.constant 0 : i32
    return %arg1, %c0_i32, %c0_i32_0 : i32, i32, i32
  }
  func.func @transform_6(%arg0: i32, %arg1: i32) -> (i32, i32, i32) {
    %c0_i32 = arith.constant 0 : i32
    %c0_i32_0 = arith.constant 0 : i32
    %c0_i32_1 = arith.constant 0 : i32
    return %arg1, %c0_i32, %c0_i32_0 : i32, i32, i32
  }
  func.func @transform_7(%arg0: i32, %arg1: i32) -> (i32, i32, i32) {
    %c0_i32 = arith.constant 0 : i32
    %c0_i32_0 = arith.constant 0 : i32
    %c0_i32_1 = arith.constant 0 : i32
    return %arg1, %c0_i32, %c0_i32_0 : i32, i32, i32
  }
  func.func @transform_8(%arg0: i32, %arg1: i32) -> (i32, i32, i32) {
    %c0_i32 = arith.constant 0 : i32
    %c0_i32_0 = arith.constant 0 : i32
    %c0_i32_1 = arith.constant 0 : i32
    return %arg1, %c0_i32, %c0_i32_0 : i32, i32, i32
  }
  func.func @transform_9(%arg0: i32, %arg1: i32) -> (i32, i32, i32) {
    %c0_i32 = arith.constant 0 : i32
    %c0_i32_0 = arith.constant 0 : i32
    %c0_i32_1 = arith.constant 0 : i32
    return %arg1, %c0_i32, %c0_i32_0 : i32, i32, i32
  }
  func.func @transform_10(%arg0: i32, %arg1: i32) -> (i32, i32, i32) {
    %c0_i32 = arith.constant 0 : i32
    %c0_i32_0 = arith.constant 0 : i32
    %c0_i32_1 = arith.constant 0 : i32
    return %arg1, %c0_i32, %c0_i32_0 : i32, i32, i32
  }
  func.func @transform_11(%arg0: i32, %arg1: i32) -> (i32, i32, i32) {
    %c0_i32 = arith.constant 0 : i32
    %c0_i32_0 = arith.constant 0 : i32
    %c0_i32_1 = arith.constant 0 : i32
    return %arg1, %c0_i32, %c0_i32_0 : i32, i32, i32
  }
  func.func @transform_12(%arg0: i32, %arg1: i32) -> (i32, i32) {
    %c0_i32 = arith.constant 0 : i32
    %c0_i32_0 = arith.constant 0 : i32
    %c0_i32_1 = arith.constant 0 : i32
    return %c0_i32, %c0_i32_0 : i32, i32
  }
  func.func @transform_13(%arg0: i32, %arg1: i32) -> (i32, i32) {
    %c0_i32 = arith.constant 0 : i32
    %c0_i32_0 = arith.constant 0 : i32
    %c0_i32_1 = arith.constant 0 : i32
    return %c0_i32, %c0_i32_0 : i32, i32
  }
  func.func @transform_14(%arg0: i32, %arg1: i32) -> (i32, i32) {
    %c0_i32 = arith.constant 0 : i32
    %c0_i32_0 = arith.constant 0 : i32
    %c0_i32_1 = arith.constant 0 : i32
    return %c0_i32, %c0_i32_0 : i32, i32
  }
  func.func @transform_15(%arg0: i32, %arg1: i32) -> (i32, i32) {
    %c0_i32 = arith.constant 0 : i32
    %c0_i32_0 = arith.constant 0 : i32
    %c0_i32_1 = arith.constant 0 : i32
    return %c0_i32, %c0_i32_0 : i32, i32
  }
  func.func @transform_16(%arg0: i32, %arg1: i32) -> (i32, i32) {
    %c0_i32 = arith.constant 0 : i32
    %c0_i32_0 = arith.constant 0 : i32
    return %arg0, %c0_i32 : i32, i32
  }
}

</mosaic_0001>

<bundles_post_ra>
// kernel: tpu_custom_call.1
= control target key start
LH: loop header
LB: loop body
LE: loop exit
PB: predicated region body
PF: predicated region fallthrough
CT: control target
= control target key end

     0   :  { %s3568_s0 = inlined_call_operand.hbm [shape: f32[16,128], index: 0, kind: input, shape index: {}]   ;;  %s3569_s1 = inlined_call_operand.hbm [shape: f32[8,8], index: 1, kind: input, shape index: {}]   ;;  %s3570_s2 = inlined_call_operand.hbm [shape: bf16[2,128,384], index: 2, kind: input, shape index: {}]   ;;  %s3571_s3 = inlined_call_operand.hbm [shape: f32[2,1,384], index: 3, kind: input, shape index: {}]   ;;  %s3572_s4 = inlined_call_operand.hbm [shape: bf16[2,128,128], index: 4, kind: input, shape index: {}]   ;;  %s3573_s5 = inlined_call_operand.vmem [shape: f32[2,1,128], index: 5, kind: input, shape index: {}]   ;;  %s3574_s6 = inlined_call_operand.vmem [shape: f32[2,2,128], index: 6, kind: input, shape index: {}]   ;;  %s3575_s7 = inlined_call_operand.vmem [shape: f32[2,1,1], index: 7, kind: input, shape index: {}]   ;;  %s3576_s8 = inlined_call_operand.hbm [shape: bf16[2,128,128], index: 8, kind: input, shape index: {}]   ;;  %s3577_s9 = inlined_call_operand.vmem [shape: f32[2,1,128], index: 9, kind: input, shape index: {}]   ;;  %s3578_s10 = inlined_call_operand.vmem [shape: f32[2,1,128], index: 10, kind: input, shape index: {}]   ;;  %s3579_s11 = inlined_call_operand.hbm [shape: f32[2,1,128], index: 11, kind: input, shape index: {}]   ;;  %s3580_s12 = inlined_call_operand.hbm [shape: bf16[128,128], index: 12, kind: input, shape index: {}]   ;;  %s3581_s13 = inlined_call_operand.vmem [shape: f32[1,128], index: 13, kind: input, shape index: {}]   ;;  %s3582_s14 = inlined_call_operand.hbm [shape: bf16[128,128], index: 14, kind: input, shape index: {}]   ;;  %s3583_s15 = inlined_call_operand.vmem [shape: f32[1,128], index: 15, kind: input, shape index: {}]   ;;  %s3584_s16 = inlined_call_operand.hbm [shape: f32[16,128], index: 16, kind: output, shape index: {}]  }
   0x1   :  { %3600 = sst [smem:[#allocation36_spill]] %s3568_s0 }
   0x2   :  { %3601 = sst [smem:[#allocation37_spill]] %s3569_s1 }
   0x3   :  { %3602 = sst [smem:[#allocation38_spill]] %s3570_s2 }
   0x4   :  { %3603 = sst [smem:[#allocation39_spill]] %s3571_s3 }
   0x5   :  { %3604 = sst [smem:[#allocation40_spill]] %s3572_s4 }
   0x6   :  { %3605 = sst [smem:[#allocation41_spill]] %s3573_s5 }
   0x7   :  { %3606 = sst [smem:[#allocation42_spill]] %s3574_s6 }
   0x8   :  { %3607 = sst [smem:[#allocation43_spill]] %s3575_s7 }
   0x9   :  { %3608 = sst [smem:[#allocation44_spill]] %s3576_s8 }
   0xa   :  { %3609 = sst [smem:[#allocation45_spill]] %s3577_s9 }
   0xb   :  { %3610 = sst [smem:[#allocation46_spill]] %s3578_s10 }
   0xc   :  { %3611 = sst [smem:[#allocation47_spill]] %s3579_s11 }
   0xd   :  { %3612 = sst [smem:[#allocation48_spill]] %s3580_s12 }
   0xe   :  { %3613 = sst [smem:[#allocation49_spill]] %s3581_s13 }
   0xf   :  { %3614 = sst [smem:[#allocation50_spill]] %s3582_s14 }
  0x10   :  { %3615 = sst [smem:[#allocation51_spill]] %s3583_s15 }
  0x11   :  { %3616 = sst [smem:[#allocation52_spill]] %s3584_s16 }
  0x12   :  { %21 = vsyncpa [#allocation4], 0 }
  0x13   :  { %23 = vsyncpa [#allocation4 + $0x1], 0 }
  0x14   :  { %24 = vsyncpa [#allocation7], 0 }
  0x15   :  { %25 = vsyncpa [#allocation15], 0 }
  0x16   :  { %26 = vsyncpa [#allocation5], 0 }
  0x17   :  { %28 = vsyncpa [#allocation5 + $0x1], 0  ;;  %s3056_s21 = smov 0   ;;  %s3058_s22 = smov 0  }
  0x18   :  { %s3060_s23 = smov 0   ;;  %s3062_s24 = smov 0  }
  0x19   :  { %s3064_s25 = smov 0   ;;  %s3066_s26 = smov 0  }
  0x1a   :  { %s3068_s27 = smov 0   ;;  %s3070_s28 = smov 0  }
  0x1b   :  { %s3072_s29 = smov 0   ;;  %s3074_s30 = smov 0  }
  0x1c   :  { %s3076_s0 = smov 0  }
  0x1d LB: > { %3617 = sst [smem:[#allocation23_spill]] %s2921_s22  ;;  %s3112_s17 = sadd.s32 4294967295, %s2957_s0   ;;  %s2957_s0 = sphi %s3076_s0, %s34_s0   ;;  %s2953_s30 = sphi %s3074_s30, %s3677_s30   ;;  %s2949_s29 = sphi %s3072_s29, %s3676_s29   ;;  %s2945_s28 = sphi %s3070_s28, %s3675_s28   ;;  %s2941_s27 = sphi %s3068_s27, %s3674_s27   ;;  %s2937_s26 = sphi %s3066_s26, %s3673_s26   ;;  %s2933_s25 = sphi %s3064_s25, %s3679_s25   ;;  %s2929_s24 = sphi %s3062_s24, %s3678_s24   ;;  %s2925_s23 = sphi %s3060_s23, %s3671_s23   ;;  %s2921_s22 = sphi %s3058_s22, %s3670_s22   ;;  %s2917_s21 = sphi %s3056_s21, %s3669_s21  }
  0x1e   : > { %3618 = sst [smem:[#allocation24_spill]] %s2925_s23  ;;  %s2023_s18 = sadd.s32 4294967294, %s2957_s0  }
  0x1f   : > { %3619 = sst [smem:[#allocation25_spill]] %s2937_s26  ;;  %s43_s19 = sadd.s32 1, %s2949_s29 }
  0x20   : > { %3620 = sst [smem:[#allocation26_spill]] %s2941_s27  ;;  %s46_s20 = sadd.s32 1, %s2953_s30 }
  0x21   : > { %3621 = sst [smem:[#allocation27_spill]] %s2945_s28  ;;  %p44_p0 = scmp.ge.s32.totalorder %s43_s19, 2 }
  0x22   : > { %3622 = sst [smem:[#allocation28_spill]] %s2949_s29  ;;  %s53_s16 = sadd.s32 1, %s2937_s26 }
  0x23   : > { %3623 = sst [smem:[#allocation29_spill]] %s2953_s30  ;;  %p60_p1 = scmp.ne.s32.totalorder %s2937_s26, %s2933_s25 }
  0x24   : > { %p61_p2 = scmp.eq.s32.totalorder %s2957_s0, 0  ;;  %s3681_s19 = smov (%p44_p0, %s43_s19), 0 }
  0x25   : > { %3624 = sst [smem:[#allocation30_spill]] %s3681_s19  ;;  %s3683_s20 = smov (!%p44_p0, %s46_s20), %s2953_s30 }
  0x26   : > { %p3129_p3 = por %p61_p2, %p60_p1  ;;  %p66_p4 = scmp.ne.s32.totalorder %s2933_s25, %s2929_s24 }
  0x27   : > { %p48_p5 = scmp.ge.s32.totalorder %s3683_s20, 2  ;;  %s97_s15 = ssub.s32 %s2949_s29, %s3681_s19 }
  0x28   : > { %p98_p6 = scmp.eq.s32.totalorder %s97_s15, 0  ;;  %s100_s13 = sadd.s32 1, %s2925_s23 }
  0x29   : > { %s3685_s20 = smov (%p48_p5, %s3683_s20), 0  ;;  %p107_p7 = scmp.ne.s32.totalorder %s2925_s23, %s2921_s22 }
  0x2a   : > { %3626 = sst [smem:[#allocation31_spill]] %s3685_s20  ;;  %s50_s9 = ssub.s32 %s2953_s30, %s3685_s20 }
  0x2b   : > { %s3141_s10 = scalar_select %p98_p6, %s2925_s23, %s100_s13  }
  0x2c   : > { %p51_p8 = scmp.eq.s32.totalorder %s50_s9, 0  ;;  %p113_p9 = scmp.ne.s32.totalorder %s2921_s22, %s2917_s21 }
  0x2d   : > { %3627 = sst [smem:[#allocation32_spill]] %s3141_s10  ;;  %p3151_p10 = por %p107_p7, %p61_p2 }
  0x2e   : > { %p455_p11 = scmp.eq.s32.totalorder %s3112_s17, 3  ;;  %p461_p13 = scmp.eq.s32.totalorder %s2023_s18, 3 }
  0x2f   : > { %s3157_s15 = scalar_select %p51_p8, %s2937_s26, %s53_s16  }
  0x30   : > { %p3162_p12 = por %p455_p11, %p60_p1  ;;  %p3169_p0 = por %p461_p13, %p66_p4 }
  0x31   : > { %3629 = sst [smem:[#allocation33_spill]] %s3157_s15  ;;  %p2413_p2 = scmp.lt.s32.totalorder %s2957_s0, 4 }
  0x32   : > { %s3630_s19 = scalar_select %p3162_p12, 1, 0 }
  0x33   : > { %s3632_s9 = scalar_select %p3169_p0, 1, 0 }
  0x34   : > { %3631 = sst [smem:[#allocation34_spill]] %s3630_s19  ;;  %s527_s13 = sand.u32 1, %s2957_s0  }
  0x35   : > { %3633 = sst [smem:[#allocation35_spill]] %s3632_s9  ;;  %s529_s20 = sand.u32 1, %s2937_s26  }
  0x36   : > { %s2029_s10 = sshll.u32 %s529_s20, 3  ;;  %s2030_s16 = sshll.u32 %s2953_s30, 3 }
  0x37   : > { %s3634_s5 = sld [smem:[#allocation36_spill]]  ;;  %s531_s11 = scalar_lea.vmem [#allocation3], %s2029_s10 }
  0x38   : > { %s539_s14 = sshll.u32 %s531_s11, 4  ;;  %p2388_p1 = pnand %p2413_p2, %p3129_p3  ;;  %s540_s14 = int_to_ptr.vmem [resolvable:$true] %s539_s14 }
  0x39   : > { %p3184_p5 = pnand %p2413_p2, %p3151_p10  ;;  %s3189_s20 = sand.u32 1, %s2925_s23  }
  0x3a   : > { %s2345_s6 = smul.u32 192, %s3189_s20  ;;  %s3636_s2 = sld [smem:[#allocation38_spill]] }
  0x3b   : > { %s2346_s10 = smul.u32 192, %s2949_s29  ;;  %s2959_s26 = smov 192  }
  0x3c   : > { %s550_s11 = scalar_lea.vmem [#allocation8], %s2345_s6  ;;  %s2347_s30 = smul.u32 3, %s3189_s20 }
  0x3d   : > { %s535_s27 = scalar_lea.hbm %s3634_s5, %s2030_s16  ;;  %s3192_s5 = scalar_lea.sflag [#allocation4], %s527_s13 }
  0x3e   : > { %s537_s19 = sshll.u32 %s535_s27, 4  ;;  %s558_s27 = sshll.u32 %s550_s11, 4  ;;  %s538_s19 = int_to_ptr.hbm [resolvable:$true] %s537_s19  ;;  %s559_s27 = int_to_ptr.vmem [resolvable:$true] %s558_s27 }
  0x3f   : > { %2390 = dma.hbm_to_vmem [thread:$0]  (!%p2388_p1), %s538_s19, 128, %s540_s14, %s3192_s5  }
  0x40   : > { %s555_s15 = scalar_lea.hbm %s3636_s2, %s2346_s10  ;;  %s2348_s13 = smul.u32 3, %s2949_s29 }
  0x41   : > { %s556_s16 = sshll.u32 %s555_s15, 4  ;;  %s2960_s23 = smov 12   ;;  %s557_s16 = int_to_ptr.hbm [resolvable:$true] %s556_s16 }
  0x42   : > { %2393 = dma.hbm_to_vmem [thread:$0]  (!%p3184_p5), %s557_s16, 3072, %s559_s27, %s3192_s5, %s2959_s26, %s2959_s26, %s2960_s23  }
  0x43   : > { %s3637_s3 = sld [smem:[#allocation39_spill]]  ;;  %s572_s9 = scalar_lea.vmem [#allocation9], %s2347_s30 }
  0x44   : > { %s580_s7 = sshll.u32 %s572_s9, 4  ;;  %s2032_s23 = sshll.u32 %s3189_s20, 6  ;;  %s581_s7 = int_to_ptr.vmem [resolvable:$true] %s580_s7 }
  0x45   : > { %s2287_s26 = sshll.u32 %s2949_s29, 6  ;;  %s3638_s4 = sld [smem:[#allocation40_spill]] }
  0x46   : > { %s591_s9 = scalar_lea.vmem [#allocation10], %s2032_s23  ;;  %s3595_s16 = smov 64  }
  0x47   : > { %s599_s15 = sshll.u32 %s591_s9, 4  ;;  %p67_p3 = scmp.eq.s32.totalorder %s3112_s17, 0  ;;  %s600_s15 = int_to_ptr.vmem [resolvable:$true] %s599_s15 }
  0x48   : > { %p2024_p6 = scmp.ge.s32.totalorder %s2957_s0, 1  ;;  %p468_p7 = scmp.lt.s32.totalorder %s2957_s0, 5 }
  0x49   : > { %s576_s6 = scalar_lea.hbm %s3637_s3, %s2348_s13  ;;  %s2962_s13 = smov 4  }
  0x4a   : > { %s578_s11 = sshll.u32 %s576_s6, 4  ;;  %s3639_s1 = sld [smem:[#allocation37_spill]]  ;;  %s579_s11 = int_to_ptr.hbm [resolvable:$true] %s578_s11 }
  0x4b   : > { %2396 = dma.hbm_to_vmem [thread:$0]  (!%p3184_p5), %s579_s11, 48, %s581_s7, %s3192_s5  }
  0x4c   : > { %s596_s30 = scalar_lea.hbm %s3638_s4, %s2287_s26  ;;  %p3232_p8 = por %p67_p3, %p66_p4 }
  0x4d   : > { %s597_s28 = sshll.u32 %s596_s30, 4  ;;  %p3241_p10 = por %p113_p9, %p67_p3  ;;  %s598_s28 = int_to_ptr.hbm [resolvable:$true] %s597_s28 }
  0x4e   : > { %2399 = dma.hbm_to_vmem [thread:$0]  (!%p3184_p5), %s598_s28, 1024, %s600_s15, %s3192_s5, %s3595_s16, %s3595_s16, %s2962_s13  }
  0x4f   : > { %p3245_p11 = pnand %p2024_p6, %p468_p7  ;;  %s2963_s27 = smov [#allocation6]  }
  0x50   : > { %s480_s6 = sshll.u32 %s3639_s1, 4  ;;  %s482_s30 = sshll.u32 %s2963_s27, 4  ;;  %s481_s6 = int_to_ptr.hbm [resolvable:$true] %s480_s6  ;;  %s483_s30 = int_to_ptr.vmem [resolvable:$true] %s482_s30 }
  0x51   : > { %p2377_p13 = pneg %p3245_p11  ;;  %s3643_s8 = sld [smem:[#allocation44_spill]] }
  0x52   : > { %s632_s19 = scalar_lea.vmem [#allocation11], %s2032_s23  ;;  %s3645_s27 = smov 64  }
  0x53   : > { %p3256_p4 = pnand %p2377_p13, %p67_p3  ;;  %s640_s16 = sshll.u32 %s632_s19, 4  ;;  %s641_s16 = int_to_ptr.vmem [resolvable:$true] %s640_s16 }
  0x54   : > { %s3646_s12 = sld [smem:[#allocation48_spill]]  ;;  %s3597_s15 = sand.u32 (!%p3245_p11), 1, %s2933_s25  }
  0x55   : > { %2380 = dma.hbm_to_vmem [thread:$0]  (!%p3256_p4), %s481_s6, 128, %s483_s30, [#allocation7]  }
  0x56   : > { %s3647_s2 = sld [smem:[#allocation50_spill]] }
  0x57   : > { %s637_s21 = scalar_lea.hbm %s3643_s8, %s2287_s26  ;;  %s3648_s28 = sld [smem:[#allocation47_spill]] }
  0x58   : > { %s638_s14 = sshll.u32 %s637_s21, 4  ;;  %s2964_s21 = smov [#allocation13]   ;;  %s639_s14 = int_to_ptr.hbm [resolvable:$true] %s638_s14 }
  0x59   : > { %2402 = dma.hbm_to_vmem [thread:$0]  (!%p3184_p5), %s639_s14, 1024, %s641_s16, %s3192_s5, %s3645_s27, %s3645_s27, %s2962_s13  }
  0x5a   : > { %s491_s9 = sshll.u32 %s3646_s12, 4  ;;  %s493_s23 = sshll.u32 %s2964_s21, 4  ;;  %s492_s9 = int_to_ptr.hbm [resolvable:$true] %s491_s9  ;;  %s494_s23 = int_to_ptr.vmem [resolvable:$true] %s493_s23 }
  0x5b   : > { %2383 = dma.hbm_to_vmem [thread:$0]  (!%p3256_p4), %s492_s9, 1024, %s494_s23, [#allocation7], %s3645_s27, %s3645_s27, %s2962_s13  }
  0x5c   : > { %s508_s6 = sshll.u32 %s3647_s2, 4  ;;  %s2965_s16 = smov [#allocation14]   ;;  %s509_s6 = int_to_ptr.hbm [resolvable:$true] %s508_s6 }
  0x5d   : > { %s510_s30 = sshll.u32 %s2965_s16, 4  ;;  %s668_s3 = scalar_lea.hbm %s3648_s28, %s2949_s29  ;;  %s511_s30 = int_to_ptr.vmem [resolvable:$true] %s510_s30 }
  0x5e   : > { %2386 = dma.hbm_to_vmem [thread:$0]  (!%p3256_p4), %s509_s6, 1024, %s511_s30, [#allocation15], %s3645_s27, %s3645_s27, %s2962_s13  }
  0x5f   : > { %s670_s1 = sshll.u32 %s668_s3, 4  ;;  %s665_s2 = scalar_lea.vmem [#allocation12], %s3189_s20  ;;  %s671_s1 = int_to_ptr.hbm [resolvable:$true] %s670_s1 }
  0x60   : > { %s672_s21 = sshll.u32 %s665_s2, 4  ;;  %681 = sbr.rel (%p3245_p11) target bundleno = 2526 (0x9de), region = 84  ;;  %s673_s21 = int_to_ptr.vmem [resolvable:$true] %s672_s21 }
  0x61   : > { %2405 = dma.hbm_to_vmem [thread:$0]  (!%p3184_p5), %s671_s1, 16, %s673_s21, %s3192_s5  }
  0x62   : > { %s683_s9 = sand.u32 (!%p3245_p11), 1, %s3112_s17   ;;  %s3298_s23 = sshll.u32 (!%p3245_p11), %s3597_s15, 3 }
  0x63   : > { %s684_s3 = scalar_lea.sflag (!%p3245_p11), [#allocation4], %s683_s9 }
  0x65   : > { %2892 = dma.done.wait (%p3232_p8), %s684_s3, 128  }
  0x66   : > { %2894 = vsyncadd (%p3232_p8), %s684_s3, 4294967168 }
  0x67   : > { %2896 = dma.done.wait (%p67_p3), [#allocation7], 128  }
  0x68   : > { %2898 = vsyncadd (%p67_p3), [#allocation7], 4294967168  ;;  %s3310_s18 = sand.u32 1, %s2921_s22  }
  0x69   : > { %s2349_s5 = smul.u32 192, %s3310_s18 }
  0x6b   : > { %s3313_s13 = scalar_lea.vmem [#allocation8], %s2349_s5 }
  0x6c   : > { %2900 = dma.done.wait (%p3241_p10), %s684_s3, 5184  }
  0x6d   : > { %2902 = vsyncadd (%p3241_p10), %s684_s3, 4294962112  ;;  %s2350_s11 = smul.u32 3, %s3310_s18  ;;  %s2041_s10 = sshll.u32 %s3310_s18, 6 }
  0x6e   : > { %s3323_s19 = scalar_lea.vmem [#allocation10], %s2041_s10  ;;  %s3325_s6 = scalar_lea.vmem [#allocation11], %s2041_s10 }
  0x6f   : > { %s3321_s27 = scalar_lea.vmem [#allocation9], %s2350_s11 }
  0x70   : > { %2904 = dma.done.wait (%p67_p3), [#allocation7], 1024  }
  0x71   : > { %2906 = vsyncadd (%p67_p3), [#allocation7], 4294966272 }
  0x72   : > { %2908 = dma.done.wait (%p67_p3), [#allocation15], 1024  }
  0x73   : > { %2910 = vsyncadd (%p67_p3), [#allocation15], 4294966272  ;;  %s3649_s7 = sld [smem:[#allocation26_spill]]  ;;  %s840_s22 = scalar_lea.vmem [#allocation16], %s3298_s23 }
  0x74   : > { %s3650_s28 = sld [smem:[#allocation41_spill]] }
  0x75   : > { %s3651_s17 = sld [smem:[#allocation42_spill]] }
  0x76   : > { %s3652_s10 = sld [smem:[#allocation43_spill]] }
  0x77   : > { %s3653_s4 = sld [smem:[#allocation45_spill]] }
  0x78   : > { %s3654_s12 = sld [smem:[#allocation46_spill]] }
  0x79   : > { %p841_p9 = scmp.lt.s32.totalorder %s3649_s7, 1  ;;  %p2047_p2 = scmp.ne.s32.totalorder %s3649_s7, 0 }
  0x7b   : > { %s3338_s30 = scalar_select %p841_p9, %s3649_s7, 1 }
  0x7c   : > { %861 = sbr.rel (%p2047_p2) target bundleno = 131 (0x83), region = 124 }
  0x7d   : > { %s843_s1 = scalar_lea.vmem %s3650_s28, %s3338_s30  ;;  %s2046_s2 = sshll.u32 %s3338_s30, 1 }
  0x7e   : > { %s3348_s3 = scalar_lea.vmem %s3651_s17, %s2046_s2  ;;  %s850_s15 = scalar_lea.vmem %s3652_s10, %s3338_s30 }
  0x7f   : > { %s853_s8 = scalar_lea.vmem %s3653_s4, %s3338_s30  ;;  %s856_s29 = scalar_lea.vmem %s3654_s12, %s3338_s30 }
  0x80   : > { %s3655_s28 = scalar_lea.vmem (!%p2047_p2), [#allocation3], %s3298_s23 }
  0x81   : > { %v862_v0 = vld [vmem:[%s3655_s28] sm:$0xff] }
  0x82   : > { %863 = vst [vmem:[#allocation2] sm:$0xff] %v862_v0 }
  0x83 PF: > { %v2134_v1 = vld [vmem:[%s3313_s13 + $0xa8] sm:$0xf]  ;;  %v2311_v2 = vld [vmem:[%s3313_s13 + $0xb0] sm:$0xf0]  ;;  %v2310_v3 = vld [vmem:[%s3313_s13 + $0xac] sm:$0xf] }
  0x84   : > { %v2135_v4 = vor.u32 %v2311_v2, %v2134_v1  ;;  %v2136_v5 = vld [vmem:[%s3313_s13 + $0xb4] sm:$0xf0]  ;;  %v2122_v6 = vld [vmem:[%s3313_s13 + $0x90] sm:$0xf]  ;;  %v2308_v7 = vld [vmem:[%s3313_s13 + $0x98] sm:$0xf0] }
  0x85   : > { %v2139_v8 = vor.u32 %v2310_v3, %v2136_v5  ;;  %v2307_v9 = vld [vmem:[%s3313_s13 + $0x94] sm:$0xf]  ;;  %v2124_v10 = vld [vmem:[%s3313_s13 + $0x9c] sm:$0xf0]  ;;  %v2123_v11 = vor.u32 %v2308_v7, %v2122_v6  ;;  %v2110_v13 = vld [vmem:[%s3313_s13 + $0x78] sm:$0xf] }
  0x86   : > { %1034 = vmatpush.bf16.msra.mxu0 %v2135_v4  ;;  %v2127_v12 = vor.u32 %v2307_v9, %v2124_v10  ;;  %v2305_v14 = vld [vmem:[%s3313_s13 + $0x80] sm:$0xf0]  ;;  %v2304_v15 = vld [vmem:[%s3313_s13 + $0x7c] sm:$0xf]  ;;  %v2112_v16 = vld [vmem:[%s3313_s13 + $0x84] sm:$0xf0] }
  0x87   : > { %1047 = vmatpush.bf16.msra.mxu1 %v2139_v8  ;;  %v2111_v17 = vor.u32 %v2305_v14, %v2110_v13  ;;  %v2115_v18 = vor.u32 %v2304_v15, %v2112_v16  ;;  %v2098_v19 = vld [vmem:[%s3313_s13 + $0x60] sm:$0xf]  ;;  %v2302_v20 = vld [vmem:[%s3313_s13 + $0x68] sm:$0xf0]  ;;  %v2301_v21 = vld [vmem:[%s3313_s13 + $0x64] sm:$0xf] }
  0x88   : > { %v2100_v22 = vld [vmem:[%s3313_s13 + $0x6c] sm:$0xf0]  ;;  %v2099_v23 = vor.u32 %v2302_v20, %v2098_v19  ;;  %v2312_v25 = vld [vmem:[%s3313_s13 + $0xb8] sm:$0xf0]  ;;  %v2130_v26 = vld [vmem:[%s3313_s13 + $0x98] sm:$0xf] }
  0x89   : > { %v2142_v24 = vld [vmem:[%s3313_s13 + $0xb0] sm:$0xf]  ;;  %v2103_v27 = vor.u32 %v2301_v21, %v2100_v22  ;;  %v2086_v28 = vld [vmem:[%s3313_s13 + $0x48] sm:$0xf]  ;;  %v2299_v29 = vld [vmem:[%s3313_s13 + $0x50] sm:$0xf0] }
  0x8a   : > { %1035 = vmatpush.bf16.msra.mxu0 %v2123_v11  ;;  %v2143_v30 = vor.u32 %v2312_v25, %v2142_v24  ;;  %v2309_v31 = vld [vmem:[%s3313_s13 + $0xa0] sm:$0xf0]  ;;  %v2298_v32 = vld [vmem:[%s3313_s13 + $0x4c] sm:$0xf]  ;;  %v2088_v33 = vld [vmem:[%s3313_s13 + $0x54] sm:$0xf0]  ;;  %v2087_v35 = vor.u32 %v2299_v29, %v2086_v28 }
  0x8b   : > { %1048 = vmatpush.bf16.msra.mxu1 %v2127_v12  ;;  %v2131_v34 = vor.u32 %v2309_v31, %v2130_v26  ;;  %v2074_v36 = vld [vmem:[%s3313_s13 + $0x30] sm:$0xf]  ;;  %v2118_v37 = vld [vmem:[%s3313_s13 + $0x80] sm:$0xf]  ;;  %v2306_v38 = vld [vmem:[%s3313_s13 + $0x88] sm:$0xf0]  ;;  %v2091_v39 = vor.u32 %v2298_v32, %v2088_v33 }
  0x8c   : > { %1060 = vmatpush.bf16.msra.mxu2 %v2143_v30  ;;  %v2296_v40 = vld [vmem:[%s3313_s13 + $0x38] sm:$0xf0]  ;;  %v2295_v41 = vld [vmem:[%s3313_s13 + $0x34] sm:$0xf]  ;;  %v2076_v42 = vld [vmem:[%s3313_s13 + $0x3c] sm:$0xf0]  ;;  %v2119_v43 = vor.u32 %v2306_v38, %v2118_v37 }
  0x8d   : > { %v2075_v44 = vor.u32 %v2296_v40, %v2074_v36  ;;  %v2106_v45 = vld [vmem:[%s3313_s13 + $0x68] sm:$0xf]  ;;  %v2303_v46 = vld [vmem:[%s3313_s13 + $0x70] sm:$0xf0]  ;;  %v2079_v47 = vor.u32 %v2295_v41, %v2076_v42  ;;  %v2062_v48 = vld [vmem:[%s3313_s13 + $0x18] sm:$0xf] }
  0x8e   : > { %1036 = vmatpush.bf16.msra.mxu0 %v2111_v17  ;;  %v2293_v49 = vld [vmem:[%s3313_s13 + $0x20] sm:$0xf0]  ;;  %v2292_v50 = vld [vmem:[%s3313_s13 + $0x1c] sm:$0xf]  ;;  %v2064_v51 = vld [vmem:[%s3313_s13 + $0x24] sm:$0xf0]  ;;  %v2107_v52 = vor.u32 %v2303_v46, %v2106_v45 }
  0x8f   : > { %1049 = vmatpush.bf16.msra.mxu1 %v2115_v18  ;;  %v2063_v53 = vor.u32 %v2293_v49, %v2062_v48  ;;  %v2094_v54 = vld [vmem:[%s3313_s13 + $0x50] sm:$0xf]  ;;  %v2300_v55 = vld [vmem:[%s3313_s13 + $0x58] sm:$0xf0]  ;;  %v2067_v56 = vor.u32 %v2292_v50, %v2064_v51  ;;  %v2050_v57 = vld [vmem:[%s3313_s13] sm:$0xf] }
  0x90   : > { %1061 = vmatpush.bf16.msra.mxu2 %v2131_v34  ;;  %v2290_v58 = vld [vmem:[%s3313_s13 + $0x8] sm:$0xf0]  ;;  %v2289_v59 = vld [vmem:[%s3313_s13 + $0x4] sm:$0xf]  ;;  %v2052_v60 = vld [vmem:[%s3313_s13 + $0xc] sm:$0xf0]  ;;  %v2095_v61 = vor.u32 %v2300_v55, %v2094_v54 }
  0x91   : > { %v2051_v62 = vor.u32 %v2290_v58, %v2050_v57  ;;  %v3408_v63 = vld [vmem:[#allocation2] sm:$0xff]  ;;  %v2082_v0 = vld [vmem:[%s3313_s13 + $0x38] sm:$0xf]  ;;  %v2055_v2 = vor.u32 %v2289_v59, %v2052_v60  ;;  %v2294_v6 = vld [vmem:[%s3313_s13 + $0x28] sm:$0xf0]  ;;  %vm1077_vm0 = vcmask 261120  }
  0x92   : > { %1037 = vmatpush.bf16.msra.mxu0 %v2099_v23  ;;  %v2297_v1 = vld [vmem:[%s3313_s13 + $0x40] sm:$0xf0]  ;;  %v865_v3 = vpack.c.bf16 %v3408_v63, %v3408_v63  ;;  %v2070_v5 = vld [vmem:[%s3313_s13 + $0x20] sm:$0xf]  ;;  %v2058_v8 = vld [vmem:[%s3313_s13 + $0x8] sm:$0xf] }
  0x93   : > { %1050 = vmatpush.bf16.msra.mxu1 %v2103_v27  ;;  %v2083_v4 = vor.u32 %v2297_v1, %v2082_v0  ;;  %v2071_v7 = vor.u32 %v2294_v6, %v2070_v5  ;;  %v2291_v9 = vld [vmem:[%s3313_s13 + $0x10] sm:$0xf0]  ;;  %v898_v11 = vld [vmem:[%s3321_s27] sm:$0x7]  ;;  %s2966_s4 = smov 64   ;;  %s2967_s12 = smov 96  }
  0x94   : > { %1062 = vmatpush.bf16.msra.mxu2 %v2119_v43  ;;  %v2059_v10 = vor.u32 %v2291_v9, %v2058_v8  ;;  %v900_v12 = vperm.slane %v898_v11, 0  ;;  %v901_v13 = vperm.slane %v898_v11, 1  ;;  %s2968_s20 = smov 32   ;;  %v902_v28 = vperm.slane %v898_v11, 2  ;;  %v1073_v36 = vld [vmem:[#allocation6] sm:$0xff]  ;;  %s3660_s17 = scalar_lea.vmem [#allocation12], %s3310_s18 }
  0x95   : > { %vm1115_vm1 = vcmask 1043456   ;;  %vm1099_vm2 = vcmask 64512   ;;  %vm1328_vm3 = vcmask 523264   ;;  %vm1330_vm4 = vcmask 785408  }
  0x96   : > { %1038 = vmatpush.bf16.msra.mxu0 %v2087_v35 }
  0x97   : > { %1051 = vmatpush.bf16.msra.mxu1 %v2091_v39 }
  0x98   : > { %1063 = vmatpush.bf16.msra.mxu2 %v2107_v52 }
  0x9a   : > { %1039 = vmatpush.bf16.msra.mxu0 %v2075_v44 }
  0x9b   : > { %1052 = vmatpush.bf16.msra.mxu1 %v2079_v47 }
  0x9c   : > { %1064 = vmatpush.bf16.msra.mxu2 %v2095_v61 }
  0x9e   : > { %1040 = vmatpush.bf16.msra.mxu0 %v2063_v53 }
  0x9f   : > { %1053 = vmatpush.bf16.msra.mxu1 %v2067_v56 }
  0xa0   : > { %1065 = vmatpush.bf16.msra.mxu2 %v2083_v4 }
  0xa2   : > { %1041 = vmatpush.bf16.msra.mxu0 %v2051_v62 }
  0xa3   : > { %1054 = vmatpush.bf16.msra.mxu1 %v2055_v2 }
  0xa4   : > { %1066 = vmatpush.bf16.msra.mxu2 %v2071_v7 }
  0xa5   : > { %1042 = vmatmul.bf16.vlgmr.msra.gmra.mxu0 %v865_v3 }
  0xa6   : > { %1055 = vmatmul.bf16.vlgmr.msra.gmra.mxu1 %v865_v3 }
  0xa8   : > { %1067 = vmatpush.bf16.msra.mxu2 %v2059_v10 }
  0xab   : > { %1068 = vmatmul.bf16.vlgmr.msra.gmra.mxu2 %v865_v3 }
 0x122   : > { %v1043_v14 = vpop.f32.mrf.mxu0 }
 0x123   : > { %v1056_v15 = vpop.f32.mrf.mxu1  ;;  %v1044_v16 = vadd.f32 %v1043_v14, %v900_v12 }
 0x124   : > { %v1057_v17 = vadd.f32 %v1056_v15, %v901_v13 }
 0x125   : > { %v1074_v19 = vpack.c.bf16 %v1044_v16, %v1044_v16 }
 0x126   : > { %v1075_v18 = vpack.c.bf16 %v1057_v17, %v1057_v17 }
 0x127   : > { %v1133_v25 = vunpack.c.l.b16 %v1074_v19 }
 0x128   : > { %v1138_v20 = vunpack.c.l.b16 %v1075_v18  ;;  %v1082_v21 = vsel %vm1077_vm0, %v1075_v18, 0 }
 0x129   : > { %1091 = vmatpush.bf16.xpose.msra.mxu3 %v1082_v21  ;;  %v1134_v26 = vpack.c.b16 %v1133_v25, %v1133_v25 }
 0x12a   : > { %v1139_v22 = vpack.c.b16 %v1138_v20, %v1138_v20  ;;  %v1045_v23 = vpop.f32.mrf.mxu0 }
 0x12b   : > { %v1058_v24 = vpop.f32.mrf.mxu1 }
 0x12c   : > { %1201 = vrot.lane.b32.xlu2 %v1139_v22, %s2966_s4  ;;  %1140 = vrot.lane.b32.xlu1 %v1139_v22, %s2967_s12 }
 0x12e   : > { %v1069_v27 = vpop.f32.mrf.mxu2 }
 0x12f   : > { %v1070_v29 = vadd.f32 %v1069_v27, %v902_v28 }
 0x130   : > { %2144 = vmatmul.msk.bf16.vlgmr.msra.gmra.mxu3 %vm1077_vm0, %v1074_v19 }
 0x131   : > { %v3426_v31 = vpack.c.bf16 %v1070_v29, %v1070_v29 }
 0x133   : > { %v1117_v32 = vsel %vm1115_vm1, %v3426_v31, 0  ;;  %v1176_v11 = vunpack.c.l.b16 %v3426_v31 }
 0x134   : > { %1199 = vrot.lane.b32.xlu2 %v1134_v26, %s2966_s4  ;;  %1135 = vrot.lane.b32.xlu1 %v1134_v26, %s2967_s12 }
 0x135   : > { %1126 = vmatpush.bf16.msrb.mxu3 %v1117_v32  ;;  %v1177_v12 = vpack.c.b16 %v1176_v11, %v1176_v11 }
 0x136   : > { %v1071_v30 = vpop.f32.mrf.mxu2 }
 0x13c   : > { %1257 = vrot.lane.b32.xlu1 %v1134_v26, %s2968_s20 }
 0x186   : > { %v1202_v49 = vpop.permute.xlu2 %1201 }
 0x187   : > { %v1207_v51 = vsel %vm1077_vm0, %v1202_v49, 0 }
 0x18e   : > { %v1200_v55 = vpop.permute.xlu2 %1199 }
 0x19e   : > { %v1141_v33 = vpop.permute.xlu1 %1140 }
 0x19f   : > { %v1146_v34 = vsel %vm1077_vm0, %v1141_v33, 0 }
 0x1a0   : > { %1155 = vmatpush.bf16.xpose.msra.mxu3 %v1146_v34 }
 0x1a6   : > { %v1136_v53 = vpop.permute.xlu1 %1135 }
 0x1ae   : > { %v1258_v56 = vpop.permute.xlu1 %1257 }
 0x1b3   : > { %v1093_v35 = vpop.f32.mrf.mxu3 }
 0x1b4   : > { %v1097_v37 = vmul.f32 0.35355338, %v1093_v35 }
 0x1b6   : > { %v1098_v38 = vadd.f32 %v1097_v37, %v1073_v36 }
 0x1b8   : > { %v1100_v39 = vsel %vm1099_vm2, %v1098_v38, -inf }
 0x1b9   : > { %1101 = vmax.xlane.f32.xlu0 %v1100_v39 }
 0x1bb   : > { %v1095_v40 = vpop.f32.mrf.mxu3 }
 0x22c   : > { %v1102_v41 = vpop.xlane.xlu0 %1101 }
 0x22d   : > { %v1103_v42 = vsub.f32 %v1098_v38, %v1102_v41 }
 0x22f   : > { %v1104_v43 = vmul.f32 1.442695, %v1103_v42 }
 0x231   : > { %2525 = vpow2.f32 %v1104_v43 }
 0x237   : > { %v2526_v44 = vpop.eup %2525 }
 0x238   : > { %v1106_v45 = vsel %vm1099_vm2, %v2526_v44, 0.0 }
 0x239   : > { %1107 = vadd.xlane.f32.xlu0 %v1106_v45 }
 0x24d   : > { %1259 = vrot.lane.b32.xlu0 %v1139_v22, %s2968_s20 }
 0x2ac   : > { %v1108_v46 = vpop.xlane.xlu0 %1107 }
 0x2ad   : > { %2527 = vrcp.f32 %v1108_v46 }
 0x2b3   : > { %v2528_v47 = vpop.eup %2527 }
 0x2b4   : > { %v1110_v48 = vmul.f32 %v2528_v47, %v2526_v44 }
 0x2b6   : > { %v1111_v50 = vpack.c.bf16 %v1110_v48, %v1110_v48 }
 0x2b8   : > { %2145 = vmatmul.msk.bf16.vlgmr.msrb.gmra.mxu3 %vm1099_vm2, %v1111_v50 }
 0x2b9   : > { %1216 = vmatpush.bf16.xpose.msrb.mxu3 %v1207_v51 }
 0x2bf   : > { %v1260_v52 = vpop.permute.xlu0 %1259 }
 0x2c0   : > { %v1265_v54 = vsel %vm1077_vm0, %v1260_v52, 0  ;;  %v2320_v52 = vld [vmem:[%s3323_s19 + $0x38] sm:$0xff] }
 0x2c1   : > { %1401 = vmatpush.bf16.msrb.mxu1 %v2320_v52  ;;  %v2970_v52 = vmov 0.0  }
 0x2c8   : > { %2146 = vmatmul.msk.bf16.vlgmr.msra.gmra.mxu3 %vm1077_vm0, %v1136_v53  ;;  %v2319_v53 = vld [vmem:[%s3323_s19 + $0x30] sm:$0xff] }
 0x2c9   : > { %1274 = vmatpush.bf16.xpose.msra.mxu3 %v1265_v54  ;;  %1402 = vmatpush.bf16.msrb.mxu1 %v2319_v53  ;;  %v2318_v54 = vld [vmem:[%s3323_s19 + $0x28] sm:$0xff] }
 0x2cd   : > { %1403 = vmatpush.bf16.msrb.mxu1 %v2318_v54 }
 0x2d8   : > { %2148 = vmatmul.msk.bf16.vlgmr.msrb.gmra.mxu3 %vm1077_vm0, %v1200_v55  ;;  %v2317_v55 = vld [vmem:[%s3323_s19 + $0x20] sm:$0xff] }
 0x2d9   : > { %1404 = vmatpush.bf16.msrb.mxu1 %v2317_v55 }
 0x2e8   : > { %2150 = vmatmul.msk.bf16.vlgmr.msra.gmra.mxu3 %vm1077_vm0, %v1258_v56  ;;  %v2316_v56 = vld [vmem:[%s3323_s19 + $0x18] sm:$0xff] }
 0x2e9   : > { %1405 = vmatpush.bf16.msrb.mxu1 %v2316_v56 }
 0x33b   : > { %v3440_v57 = vpop.f32.mrf.mxu3 }
 0x343   : > { %v1130_v58 = vpop.f32.mrf.mxu3 }
 0x344   : > { %v2315_v58 = vld [vmem:[%s3323_s19 + $0x10] sm:$0xff] }
 0x345   : > { %1406 = vmatpush.bf16.msrb.mxu1 %v2315_v58 }
 0x34b   : > { %v1157_v59 = vpop.f32.mrf.mxu3 }
 0x34c   : > { %v1161_v60 = vmul.f32 0.35355338, %v1157_v59  ;;  %v2314_v59 = vld [vmem:[%s3323_s19 + $0x8] sm:$0xff] }
 0x34d   : > { %1407 = vmatpush.bf16.msrb.mxu1 %v2314_v59 }
 0x34e   : > { %v1162_v61 = vadd.f32 %v1161_v60, %v1073_v36  ;;  %v2313_v60 = vld [vmem:[%s3323_s19] sm:$0xff] }
 0x350   : > { %v1163_v62 = vsel %vm1099_vm2, %v1162_v61, -inf }
 0x351   : > { %1164 = vmax.xlane.f32.xlu2 %v1163_v62  ;;  %1408 = vmatpush.bf16.msrb.mxu1 %v2313_v60 }
 0x353   : > { %v1159_v0 = vpop.f32.mrf.mxu3 }
 0x35b   : > { %v1218_v1 = vpop.f32.mrf.mxu3 }
 0x35c   : > { %v1222_v2 = vmul.f32 0.35355338, %v1218_v1 }
 0x35e   : > { %v1223_v3 = vadd.f32 %v1222_v2, %v1073_v36 }
 0x360   : > { %v1224_v4 = vsel %vm1099_vm2, %v1223_v3, -inf }
 0x361   : > { %1225 = vmax.xlane.f32.xlu1 %v1224_v4 }
 0x363   : > { %v1220_v5 = vpop.f32.mrf.mxu3 }
 0x364   : > { %v1414_v5 = vld [vmem:[%s3348_s3] sm:$0x3]  ;;  %s3661_s3 = sld [smem:[#allocation26_spill]] }
 0x36a   : > { %p2218_p1 = scmp.ne.s32.totalorder %s3661_s3, 1 }
 0x36b   : > { %v1276_v6 = vpop.f32.mrf.mxu3  ;;  %s3662_s30 = sld [smem:[#allocation49_spill]] (!%p2218_p1) }
 0x36c   : > { %v1280_v7 = vmul.f32 0.35355338, %v1276_v6  ;;  %v2520_v6 = vld [vmem:[%s843_s1] ss:$0 sm:$0xff]  ;;  %s3663_s10 = sld [smem:[#allocation51_spill]] (!%p2218_p1) }
 0x36e   : > { %v1281_v8 = vadd.f32 %v1280_v7, %v1073_v36  ;;  %v1415_v7 = vperm.slane %v1414_v5, 0 }
 0x370   : > { %v1282_v9 = vsel %vm1099_vm2, %v1281_v8, -inf }
 0x371   : > { %1283 = vmax.xlane.f32.xlu0 %v1282_v9 }
 0x373   : > { %v1278_v10 = vpop.f32.mrf.mxu3 }
 0x385   : > { %1236 = vrot.lane.b32.xlu0 %v1177_v12, %s2966_s4 }
 0x3c4   : > { %v1165_v13 = vpop.xlane.xlu2 %1164 }
 0x3c5   : > { %v1166_v14 = vsub.f32 %v1162_v61, %v1165_v13 }
 0x3c7   : > { %v1167_v15 = vmul.f32 1.442695, %v1166_v14  ;;  %v2969_v14 = vmov 0  }
 0x3c8   : > { %2518 = vset.pattern.permute.xlu0 %v2969_v14  ;;  %2519 = vset.pattern.permute.xlu1 %v2969_v14 }
 0x3c9   : > { %2529 = vpow2.f32 %v1167_v15  ;;  %v2521_v15 = vld [vmem:[%s850_s15] ss:$0 sm:$0xff] }
 0x3cf   : > { %v2530_v16 = vpop.eup %2529 }
 0x3d0   : > { %v1169_v17 = vsel %vm1099_vm2, %v2530_v16, 0.0 }
 0x3d1   : > { %1170 = vadd.xlane.f32.xlu2 %v1169_v17 }
 0x3d4   : > { %v1226_v18 = vpop.xlane.xlu1 %1225 }
 0x3d5   : > { %v1227_v19 = vsub.f32 %v1223_v3, %v1226_v18  ;;  %v2328_v18 = vld [vmem:[%s3325_s6 + $0x38] sm:$0xff] }
 0x3d7   : > { %v1228_v20 = vmul.f32 1.442695, %v1227_v19 }
 0x3d9   : > { %2531 = vpow2.f32 %v1228_v20  ;;  %v2327_v20 = vld [vmem:[%s3325_s6 + $0x30] sm:$0xff] }
 0x3df   : > { %v2532_v21 = vpop.eup %2531 }
 0x3e0   : > { %v1230_v22 = vsel %vm1099_vm2, %v2532_v21, 0.0 }
 0x3e1   : > { %1231 = vadd.xlane.f32.xlu1 %v1230_v22 }
 0x3e4   : > { %v1284_v23 = vpop.xlane.xlu0 %1283 }
 0x3e5   : > { %v1285_v24 = vsub.f32 %v1281_v8, %v1284_v23  ;;  %v1417_v8 = vperm.slane %v1414_v5, 1  ;;  %v2325_v23 = vld [vmem:[%s3325_s6 + $0x20] sm:$0xff] }
 0x3e7   : > { %v1286_v25 = vmul.f32 1.442695, %v1285_v24 }
 0x3e9   : > { %2533 = vpow2.f32 %v1286_v25  ;;  %1178 = vrot.lane.b32.xlu2 %v1177_v12, %s2967_s12  ;;  %v2324_v25 = vld [vmem:[%s3325_s6 + $0x18] sm:$0xff] }
 0x3ef   : > { %v2534_v26 = vpop.eup %2533 }
 0x3f0   : > { %v1288_v27 = vsel %vm1099_vm2, %v2534_v26, 0.0 }
 0x3f1   : > { %1289 = vadd.xlane.f32.xlu1 %v1288_v27 }
 0x3f7   : > { %v1237_v28 = vpop.permute.xlu0 %1236 }
 0x3f8   : > { %v1242_v29 = vsel %vm1115_vm1, %v1237_v28, 0 }
 0x3f9   : > { %1251 = vmatpush.bf16.msrb.mxu2 %v1242_v29 }
 0x3fd   : > { %1529 = vmatpush.bf16.msra.mxu2 %v2328_v18 }
 0x401   : > { %1530 = vmatpush.bf16.msra.mxu2 %v2327_v20 }
 0x40a   : > { %1294 = vrot.lane.b32.xlu1 %v1177_v12, %s2968_s20 }
 0x444   : > { %v1171_v30 = vpop.xlane.xlu2 %1170 }
 0x445   : > { %2535 = vrcp.f32 %v1171_v30 }
 0x44b   : > { %v2536_v31 = vpop.eup %2535 }
 0x44c   : > { %v1173_v32 = vmul.f32 %v2536_v31, %v2530_v16  ;;  %v1179_v33 = vpop.permute.xlu2 %1178 }
 0x44d   : > { %v1184_v34 = vsel %vm1115_vm1, %v1179_v33, 0 }
 0x44e   : > { %1193 = vmatpush.bf16.msrb.mxu0 %v1184_v34  ;;  %v1174_v35 = vpack.c.bf16 %v1173_v32, %v1173_v32 }
 0x451   : > { %2147 = vmatmul.msk.bf16.vlgmr.msrb.gmra.mxu0 %vm1099_vm2, %v1174_v35 }
 0x454   : > { %v1232_v36 = vpop.xlane.xlu1 %1231 }
 0x455   : > { %2537 = vrcp.f32 %v1232_v36 }
 0x45b   : > { %v2538_v37 = vpop.eup %2537 }
 0x45c   : > { %v1234_v38 = vmul.f32 %v2538_v37, %v2532_v21  ;;  %v2326_v21 = vld [vmem:[%s3325_s6 + $0x28] sm:$0xff] }
 0x45d   : > { %1531 = vmatpush.bf16.msra.mxu2 %v2326_v21 }
 0x45e   : > { %v1235_v39 = vpack.c.bf16 %v1234_v38, %v1234_v38  ;;  %v2322_v38 = vld [vmem:[%s3325_s6 + $0x8] sm:$0xff] }
 0x460   : > { %2149 = vmatmul.msk.bf16.vlgmr.msrb.gmra.mxu2 %vm1099_vm2, %v1235_v39  ;;  %v2321_v39 = vld [vmem:[%s3325_s6] sm:$0xff] }
 0x461   : > { %1532 = vmatpush.bf16.msra.mxu2 %v2325_v23 }
 0x464   : > { %v1290_v40 = vpop.xlane.xlu1 %1289 }
 0x465   : > { %2539 = vrcp.f32 %v1290_v40  ;;  %1533 = vmatpush.bf16.msra.mxu2 %v2324_v25 }
 0x46b   : > { %v2540_v41 = vpop.eup %2539 }
 0x46c   : > { %v1292_v42 = vmul.f32 %v2540_v41, %v2534_v26  ;;  %v2323_v26 = vld [vmem:[%s3325_s6 + $0x10] sm:$0xff] }
 0x46d   : > { %1534 = vmatpush.bf16.msra.mxu2 %v2323_v26 }
 0x46e   : > { %v1293_v45 = vpack.c.bf16 %v1292_v42, %v1292_v42 }
 0x471   : > { %1535 = vmatpush.bf16.msra.mxu2 %v2322_v38 }
 0x475   : > { %1536 = vmatpush.bf16.msra.mxu2 %v2321_v39 }
 0x47c   : > { %v1295_v43 = vpop.permute.xlu1 %1294 }
 0x47d   : > { %v1300_v44 = vsel %vm1115_vm1, %v1295_v43, 0 }
 0x47e   : > { %1309 = vmatpush.bf16.msra.mxu0 %v1300_v44 }
 0x481   : > { %2151 = vmatmul.msk.bf16.vlgmr.msra.gmra.mxu0 %vm1099_vm2, %v1293_v45 }
 0x4ce   : > { %v1195_v46 = vpop.f32.mrf.mxu0 }
 0x4cf   : > { %1316 = vrot.lane.b32.xlu2 %v1195_v46, %s2968_s20  ;;  %v1544_v46 = vlaneseq }
 0x4d6   : > { %v1197_v47 = vpop.f32.mrf.mxu0 }
 0x4d7   : > { %v2522_v47 = vld [vmem:[%s853_s8] ss:$0 sm:$0xff] }
 0x4e3   : > { %v1253_v48 = vpop.f32.mrf.mxu2 }
 0x4e4   : > { %1320 = vrot.lane.b32.xlu2 %v1253_v48, %s2966_s4  ;;  %v1545_v48 = vand.u32 127, %v1544_v46 }
 0x4e6   : > { %vm1546_vm9 = vcmp.lt.s32.totalorder %v1545_v48, 32 }
 0x4e7   : > { %v2217_v53 = vsel %vm1546_vm9, 1.0, %v2970_v52 }
 0x4eb   : > { %v1255_v49 = vpop.f32.mrf.mxu2 }
 0x4fe   : > { %v1311_v50 = vpop.f32.mrf.mxu0 }
 0x4ff   : > { %1324 = vrot.lane.b32.xlu0 %v1311_v50, %s2967_s12 }
 0x506   : > { %v1313_v51 = vpop.f32.mrf.mxu0 }
 0x529   : > { %v1317_v61 = vpop.permute.xlu2 %1316 }
 0x52a   : > { %v1327_v0 = vsel %vm1077_vm0, %v3440_v57, %v1317_v61  ;;  %v1416_v57 = vmul.f32 %v1415_v7, %v3408_v63 }
 0x53e   : > { %v1321_v62 = vpop.permute.xlu2 %1320 }
 0x53f   : > { %v1329_v1 = vsel %vm1328_vm3, %v1327_v0, %v1321_v62 }
 0x571   : > { %v1325_v2 = vpop.permute.xlu0 %1324 }
 0x572   : > { %v1331_v3 = vsel %vm1330_vm4, %v1329_v1, %v1325_v2 }
 0x573   : > { %v1332_v4 = vpack.c.bf16 %v1331_v3, %v1331_v3 }
 0x575   : > { %1409 = vmatmul.bf16.vlgmr.msrb.gmra.mxu1 %v1332_v4 }
 0x5f2   : > { %v1410_v9 = vpop.f32.mrf.mxu1 }
 0x5f3   : > { %v1411_v10 = vadd.f32 %v2520_v6, %v1410_v9 }
 0x5f5   : > { %v1418_v11 = vmul.f32 %v1417_v8, %v1411_v10  ;;  %v2523_v8 = vld [vmem:[%s856_s29] ss:$0 sm:$0xff] }
 0x5f7   : > { %v1419_v12 = vadd.f32 %v1418_v11, %v1416_v57 }
 0x5f9   : > { %1420 = vadd.xlane.f32.xlu2 %v1419_v12 }
 0x5fa   : > { %v1412_v13 = vpop.f32.mrf.mxu1 }
 0x66c   : > { %v1421_v16 = vpop.xlane.xlu2 %1420 }
 0x66d   : > { %v1426_v17 = vadd.f32 %v2521_v15, %v1421_v16 }
 0x66f   : > { %v2184_v19 = vmul.f32 -1.442695, %v1426_v17 }
 0x671   : > { %2541 = vpow2.f32 %v2184_v19 }
 0x677   : > { %v2542_v22 = vpop.eup %2541 }
 0x678   : > { %v1430_v24 = vadd.f32 1.0, %v2542_v22 }
 0x67a   : > { %2543 = vrcp.f32 %v1430_v24  ;;  %v1442_v30 = vand.u32 2147483648, %v1430_v24  ;;  %v1440_v32 = vand.u32 2147483647, %v1430_v24  ;;  %vm1436_vm6 = vweird.f32 %v1430_v24 }
 0x67c   : > { %v1443_v34 = vor.u32 1.1754944e-38, %v1442_v30  ;;  %vm1441_vm8 = vcmp.eq.f32.partialorder %v1440_v32, 8.507059e+37 }
 0x680   : > { %v2544_v27 = vpop.eup %2543 }
 0x681   : > { %v1432_v28 = vmul.f32 %v2544_v27, %v1430_v24  ;;  %vm1437_vm5 = vweird.f32 %v2544_v27 }
 0x682   : > { %vm1438_vm7 = vmor %vm1436_vm6, %vm1437_vm5 }
 0x683   : > { %v1433_v29 = vsub.f32 1.0, %v1432_v28 }
 0x685   : > { %v1434_v31 = vmul.f32 %v2544_v27, %v1433_v29 }
 0x687   : > { %v1435_v33 = vadd.f32 %v2544_v27, %v1434_v31 }
 0x689   : > { %v1439_v35 = vsel %vm1438_vm7, %v2544_v27, %v1435_v33 }
 0x68a   : > { %v1444_v36 = vsel %vm1441_vm8, %v1443_v34, %v1439_v35 }
 0x68b   : > { %1448 = vperm.xlu0 %2518, %v1444_v36   ;;  %v1452_v37 = vsub.f32 1.0, %v1444_v36 }
 0x68d   : > { %1455 = vperm.xlu1 %2519, %v1452_v37  }
 0x6fd   : > { %v1449_v40 = vpop.permute.xlu0 %1448 }
 0x6fe   : > { %v1451_v42 = vmul.f32 %v1449_v40, %v3408_v63 }
 0x6ff   : > { %v1456_v41 = vpop.permute.xlu1 %1455 }
 0x700   : > { %v1458_v43 = vmul.f32 %v1456_v41, %v1411_v10  ;;  %v2524_v10 = vld [vmem:[%s3660_s17] ss:$0 sm:$0xff] }
 0x702   : > { %v1459_v44 = vadd.f32 %v1458_v43, %v1451_v42 }
 0x704   : > { %v1460_v45 = vpack.c.bf16 %v1459_v44, %v1459_v44 }
 0x706   : > { %1537 = vmatmul.bf16.vlgmr.msra.gmra.mxu2 %v1460_v45 }
 0x789   : > { %v1538_v49 = vpop.f32.mrf.mxu2 }
 0x78a   : > { %v1539_v50 = vadd.f32 %v2522_v47, %v1538_v49 }
 0x78c   : > { %v1542_v51 = vmax.f32 %v1539_v50, 0.0 }
 0x78e   : > { %v1543_v54 = vadd.f32 %v1542_v51, %v1459_v44 }
 0x790   : > { %v1549_v55 = vmul.f32 %v2217_v53, %v1543_v54 }
 0x791   : > { %v1540_v63 = vpop.f32.mrf.mxu2 }
 0x792   : > { %1550 = vadd.xlane.f32.xlu1 %v1549_v55 }
 0x805   : > { %v1551_v56 = vpop.xlane.xlu1 %1550 }
 0x806   : > { %v1552_v58 = vmul.f32 0.03125, %v1551_v56 }
 0x808   : > { %v1553_v59 = vsub.f32 %v1543_v54, %v1552_v58 }
 0x80a   : > { %v1554_v60 = vmul.f32 %v2217_v53, %v1553_v59 }
 0x80c   : > { %v1555_v61 = vmul.f32 %v1554_v60, %v1554_v60 }
 0x80e   : > { %1556 = vadd.xlane.f32.xlu0 %v1555_v61 }
 0x881   : > { %v1557_v62 = vpop.xlane.xlu0 %1556 }
 0x882   : > { %v1558_v0 = vmul.f32 0.03125, %v1557_v62 }
 0x884   : > { %v1559_v1 = vadd.f32 1e-05, %v1558_v0 }
 0x886   : > { %2545 = vrsqrt.f32 %v1559_v1  ;;  %vm1566_vm11 = vweird.f32 %v1559_v1 }
 0x88c   : > { %v2546_v2 = vpop.eup %2545 }
 0x88d   : > { %v1561_v3 = vmul.f32 %v2546_v2, %v1559_v1  ;;  %vm1567_vm10 = vweird.f32 %v2546_v2 }
 0x88e   : > { %vm1568_vm12 = vmor %vm1566_vm11, %vm1567_vm10 }
 0x88f   : > { %v1562_v4 = vmul.f32 %v2546_v2, %v1561_v3 }
 0x891   : > { %v1563_v5 = vmul.f32 0.5, %v1562_v4 }
 0x893   : > { %v1564_v6 = vsub.f32 1.5, %v1563_v5 }
 0x895   : > { %v1565_v7 = vmul.f32 %v2546_v2, %v1564_v6 }
 0x897   : > { %v1569_v9 = vsel %vm1568_vm12, %v2546_v2, %v1565_v7 }
 0x898   : > { %v1570_v57 = vmul.f32 %v1569_v9, %v1554_v60 }
 0x89a   : > { %v1575_v11 = vmul.f32 %v2523_v8, %v1570_v57  ;;  %1585 = sbr.rel (%p2218_p1) target bundleno = 2505 (0x9c9), region = 128 }
 0x89c   : > { %v1580_v12 = vadd.f32 %v2524_v10, %v1575_v11 }
 0x89e   : > { %1581 = vst [vmem:[#allocation2] sm:$0xff] %v1580_v12 }
 0x89f   : > { %v2336_v13 = vld [vmem:[#allocation13 + $0x38] sm:$0xff]  ;;  %v2335_v14 = vld [vmem:[#allocation13 + $0x30] sm:$0xff]  ;;  %v2334_v17 = vld [vmem:[#allocation13 + $0x28] sm:$0xff]  ;;  %v1586_v27 = vpack.c.bf16 %v1580_v12, %v1580_v12 }
 0x8a0   : > { %1655 = vmatpush.bf16.msra.mxu0 %v2336_v13  ;;  %v2344_v15 = vld [vmem:[#allocation14 + $0x38] sm:$0xff]  ;;  %v2343_v16 = vld [vmem:[#allocation14 + $0x30] sm:$0xff]  ;;  %v2342_v18 = vld [vmem:[#allocation14 + $0x28] sm:$0xff] }
 0x8a1   : > { %1738 = vmatpush.bf16.msra.mxu1 %v2344_v15  ;;  %v2333_v19 = vld [vmem:[#allocation13 + $0x20] sm:$0xff]  ;;  %v2332_v21 = vld [vmem:[#allocation13 + $0x18] sm:$0xff]  ;;  %v2331_v23 = vld [vmem:[#allocation13 + $0x10] sm:$0xff] }
 0x8a2   : > { %v2341_v20 = vld [vmem:[#allocation14 + $0x20] sm:$0xff]  ;;  %v2340_v22 = vld [vmem:[#allocation14 + $0x18] sm:$0xff]  ;;  %v2339_v24 = vld [vmem:[#allocation14 + $0x10] sm:$0xff] }
 0x8a3   : > { %v2330_v25 = vld [vmem:[#allocation13 + $0x8] sm:$0xff]  ;;  %v2329_v26 = vld [vmem:[#allocation13] sm:$0xff]  ;;  %v2547_v30 = vld [vmem:[%s3662_s30] ss:$0 sm:$0xff] }
 0x8a4   : > { %1656 = vmatpush.bf16.msra.mxu0 %v2335_v14  ;;  %v2338_v28 = vld [vmem:[#allocation14 + $0x8] sm:$0xff]  ;;  %v2337_v29 = vld [vmem:[#allocation14] sm:$0xff]  ;;  %v2548_v36 = vld [vmem:[%s3663_s10] ss:$0 sm:$0xff] }
 0x8a5   : > { %1739 = vmatpush.bf16.msra.mxu1 %v2343_v16 }
 0x8a8   : > { %1657 = vmatpush.bf16.msra.mxu0 %v2334_v17 }
 0x8a9   : > { %1740 = vmatpush.bf16.msra.mxu1 %v2342_v18 }
 0x8ac   : > { %1658 = vmatpush.bf16.msra.mxu0 %v2333_v19 }
 0x8ad   : > { %1741 = vmatpush.bf16.msra.mxu1 %v2341_v20 }
 0x8b0   : > { %1659 = vmatpush.bf16.msra.mxu0 %v2332_v21 }
 0x8b1   : > { %1742 = vmatpush.bf16.msra.mxu1 %v2340_v22 }
 0x8b4   : > { %1660 = vmatpush.bf16.msra.mxu0 %v2331_v23 }
 0x8b5   : > { %1743 = vmatpush.bf16.msra.mxu1 %v2339_v24 }
 0x8b8   : > { %1661 = vmatpush.bf16.msra.mxu0 %v2330_v25 }
 0x8b9   : > { %1744 = vmatpush.bf16.msra.mxu1 %v2338_v28 }
 0x8bc   : > { %1662 = vmatpush.bf16.msra.mxu0 %v2329_v26 }
 0x8bd   : > { %1745 = vmatpush.bf16.msra.mxu1 %v2337_v29 }
 0x8bf   : > { %1663 = vmatmul.bf16.vlgmr.msra.gmra.mxu0 %v1586_v27 }
 0x93c   : > { %v1664_v31 = vpop.f32.mrf.mxu0 }
 0x93d   : > { %v1665_v32 = vadd.f32 %v2547_v30, %v1664_v31 }
 0x93f   : > { %v1668_v33 = vmax.f32 %v1665_v32, 0.0 }
 0x941   : > { %v1669_v34 = vpack.c.bf16 %v1668_v33, %v1668_v33 }
 0x943   : > { %1746 = vmatmul.bf16.vlgmr.msra.gmra.mxu1 %v1669_v34 }
 0x944   : > { %v1666_v35 = vpop.f32.mrf.mxu0 }
 0x9c0   : > { %v1747_v37 = vpop.f32.mrf.mxu1 }
 0x9c1   : > { %v1748_v38 = vadd.f32 %v2548_v36, %v1747_v37 }
 0x9c3   : > { %1751 = vst [vmem:[%s840_s22] sm:$0xff] %v1748_v38 }
 0x9c8   : > { %v1749_v39 = vpop.f32.mrf.mxu1 }
 0x9c9 PF: > { %s3664_s14 = sld [smem:[#allocation27_spill]]  ;;  %s1765_s27 = sshll.u32 %s840_s22, 4  ;;  %s1766_s27 = int_to_ptr.vmem [resolvable:$true] %s1765_s27 }
 0x9ca   : > { %s3666_s20 = sld [smem:[#allocation52_spill]]  ;;  %s3667_s19 = sand.u32 1, %s2933_s25  }
 0x9cb   : > { %s1753_s7 = scalar_lea.sflag [#allocation5], %s3667_s19 }
 0x9cf   : > { %s2284_s28 = sshll.u32 %s3664_s14, 3 }
 0x9d0   : > { %s1763_s13 = scalar_lea.hbm %s3666_s20, %s2284_s28  ;;  %s2839_s8 = scalar_lea.hbm %s3666_s20, 16 }
 0x9d1   : > { %s1767_s16 = sshll.u32 %s1763_s13, 4  ;;  %s1768_s16 = int_to_ptr.hbm [resolvable:$true] %s1767_s16 }
 0x9d2   : > { %s2833_s1 = sshra.s32 %s1768_s16, 4  ;;  %s2834_s1 = int_to_ptr.hbm [resolvable:$true] %s2833_s1 }
 0x9d3   : > { %s2835_s15 = scalar_lea.hbm %s2834_s1, 8  ;;  %p2840_p7 = scmp.lt.s32.totalorder %s2834_s1, %s3666_s20 }
 0x9d4   : > { %p2836_p5 = scmp.ne.s32.totalorder %s2834_s1, %s2835_s15  ;;  %p2841_p8 = scmp.lt.s32.totalorder %s2839_s8, %s2835_s15 }
 0x9d6   : > { %p2837_p3 = pnand %p2836_p5, %p3162_p12  ;;  %p2842_p10 = por %p2841_p8, %p2840_p7 }
 0x9d8   : > { %p2838_p6 = pneg %p2837_p3 }
 0x9da   : > { %p2843_p11 = pnand %p2842_p10, %p2838_p6 }
 0x9dc   : > { %2846 = shalt.err (!%p2843_p11)
}
 0x9dd   : > { %2375 = dma.vmem_to_hbm [thread:$0]  (%p3162_p12), %s1766_s27, 128, %s1768_s16, %s1753_s7  }
 0x9de PF: > { %p2417_p13 = scmp.ge.s32.totalorder %s2957_s0, 2  ;;  %s1779_s23 = sand.u32 1, %s2929_s24  }
 0x9df   : > { %s1780_s17 = scalar_lea.sflag [#allocation5], %s1779_s23 }
 0x9e0   : > { %p2407_p4 = pnand %p2417_p13, %p3169_p0 }
 0x9e2   : > { %p2408_p9 = pneg %p2407_p4 }
 0x9e4   : > { %2912 = dma.done.wait (%p2408_p9), %s1780_s17, 128  }
 0x9e5   : > { %2914 = vsyncadd (%p2408_p9), %s1780_s17, 4294967168  ;;  %s34_s0 = sadd.s32 1, %s2957_s0   ;;  %s3669_s21 = sld [smem:[#allocation23_spill]] }
 0x9e6   : > { %p31_p2 = scmp.ge.s32.totalorder %s34_s0, 6   ;;  %s3670_s22 = sld [smem:[#allocation24_spill]] }
 0x9e7   : > { %s3671_s23 = sld [smem:[#allocation32_spill]]  ;;  %s3678_s24 = smov %s2933_s25 }
 0x9e8   : > { %s3672_s3 = sld [smem:[#allocation25_spill]] }
 0x9e9   : > { %s3673_s26 = sld [smem:[#allocation33_spill]] }
 0x9ea   : > { %s3674_s27 = sld [smem:[#allocation28_spill]]  ;;  %33 = sbr.rel (!%p31_p2) target bundleno = 29 (0x1d), region = 219 }
 0x9eb   : > { %s3675_s28 = sld [smem:[#allocation29_spill]] }
 0x9ec   : > { %s3676_s29 = sld [smem:[#allocation30_spill]] }
 0x9ed   : > { %s3677_s30 = sld [smem:[#allocation31_spill]] }
 0x9ee   : > { %s3679_s25 = smov %s3672_s3 }
 0x9ef   :  { %1786 = vsyncpa [#allocation4], 1 }
 0x9f0   :  { %1788 = vsyncpa [#allocation4 + $0x1], 1 }
 0x9f1   :  { %1789 = vsyncpa [#allocation7], 1 }
 0x9f2   :  { %1790 = vsyncpa [#allocation15], 1 }
 0x9f3   :  { %1791 = vsyncpa [#allocation5], 1 }
 0x9f4   :  { %1793 = vsyncpa [#allocation5 + $0x1], 1 }

</bundles_post_ra>
